<compile_context>
chip_gen: v7x
topology: tpu7x:2x2x1
jax: 0.10.0
libtpu: 0.0.40
codegen_flags: <defaults>
</compile_context>

<pallas_src>
import math

import numpy as np
import jax
import jax.numpy as jnp
from jax.experimental import pallas as pl
from jax.experimental.pallas import tpu as pltpu


def build_cayley_cl3():
    """Cayley table of Clifford algebra Cl(3,0): 8 blades, ordered by grade."""
    blades = [0b000, 0b001, 0b010, 0b100, 0b011, 0b101, 0b110, 0b111]
    idx = {b: i for i, b in enumerate(blades)}
    E = len(blades)
    C = np.zeros((E, E, E), dtype=np.float32)

    def sign(a, b):
        s, aa = 0, a >> 1
        while aa:
            s += bin(aa & b).count("1")
            aa >>= 1
        return -1.0 if (s & 1) else 1.0

    for a in blades:
        for b in blades:
            C[idx[a], idx[a ^ b], idx[b]] = sign(a, b)
    return jnp.asarray(C)


def _ln(y, g, b, eps=1e-5):
    mu = jnp.mean(y, axis=-1, keepdims=True)
    var = jnp.mean((y - mu) ** 2, axis=-1, keepdims=True)
    return (y - mu) * jax.lax.rsqrt(var + eps) * g + b


def encoder_layer_kernel(
    x_ref, w2d_ref, rsum_ref, qkb_ref, ccat_ref, tsel_ref, rselt_ref,
    wvt_ref, w1t_ref, w2t_ref, w3t_ref, wit_ref, wot_ref, vece_ref, vech_ref,
    out_ref,
):
    S = x_ref.shape[1]
    E = x_ref.shape[2]
    x = x_ref[0]                                              # (S, E)

    # ---- unpack consolidated parameter slabs ----
    vece = vece_ref[...]                                      # (8, E)
    g1, bt1 = vece[0:1], vece[1:2]
    ggp, bgp = vece[2:3], vece[3:4]
    g2, bt2 = vece[4:5], vece[5:6]
    bv, bo = vece[6:7], vece[7:8]
    vech = vech_ref[...]                                      # (3, H)
    b1, b2, bi = vech[0:1], vech[1:2], vech[2:3]

    # ---- norm1 ----
    xn = _ln(x, g1, bt1)

    # ---- value projection (f32; not under autocast in the reference) ----
    v = jnp.dot(xn, wvt_ref[...], preferred_element_type=jnp.float32) + bv

    # ---- fused MVLinear q/k projections: single MXU matmul ----
    #   qk[r, i] = sum_m W2d[r*S + m, i] * xn[m, i],   r = proj*S + n
    xn_tiled = jnp.concatenate([xn] * (2 * S), axis=0)        # (2*S*S, E)
    qk = jnp.dot(rsum_ref[...], w2d_ref[...] * xn_tiled,
                 preferred_element_type=jnp.float32) + qkb_ref[...]   # (2S, E)
    qk = _ln(qk, ggp, bgp)
    # round to bf16 (stand-in for the module's fp16 autocast of q/k)
    q = qk[0:S, :].astype(jnp.bfloat16).astype(jnp.float32)
    k = qk[S:2 * S, :].astype(jnp.bfloat16).astype(jnp.float32)

    # ---- pairwise geometric product: mv[m*S+n, j] = sum_{i,l} q[m,i] C[i,j,l] k[n,l]
    # q_rep[m*S+n] = q[m] (row repeat), k_rep[m*S+n] = k[n] (block tile); built
    # in-register instead of selection matmuls.
    q_rep = jnp.concatenate(
        [jnp.broadcast_to(q[m:m + 1, :], (S, E)) for m in range(S)], axis=0)  # (S*S, E)
    k_rep = jnp.concatenate([k] * S, axis=0)                                   # (S*S, E)

    # single bf16 MXU matmul against the flattened Cayley table:
    #   kc[p, i*E + j] = sum_l k_rep[p, l] * C[i, j, l]
    kc = jnp.dot(k_rep.astype(jnp.bfloat16), ccat_ref[...],
                 preferred_element_type=jnp.float32)                           # (S*S, E*E)
    mv = jnp.zeros((S * S, E), jnp.float32)
    for i in range(E):                                        # 8 cheap VPU FMAs
        mv = mv + q_rep[:, i:i + 1] * kc[:, i * E:(i + 1) * E]

    # ---- attention-score MLP (bf16 MXU operands, f32 accumulation) ----
    h = jnp.maximum(jnp.dot(mv.astype(jnp.bfloat16), w1t_ref[...],
                            preferred_element_type=jnp.float32) + b1, 0.0)
    h = jnp.maximum(jnp.dot(h.astype(jnp.bfloat16), w2t_ref[...],
                            preferred_element_type=jnp.float32) + b2, 0.0)
    s = jnp.dot(h.astype(jnp.bfloat16), w3t_ref[...],
                preferred_element_type=jnp.float32)                            # (S*S, 1)
    # The final att_prj bias is a constant shift of every score; softmax is
    # invariant to it, so it is dropped from the kernel.

    # un-flatten pair scores to (S, S) with one tiny selection matmul
    scores = jnp.dot(rselt_ref[...], s * tsel_ref[...],
                     preferred_element_type=jnp.float32)                       # (S, S)

    # ---- softmax over keys (reciprocal on the EUP) ----
    e = jnp.exp(scores - jnp.max(scores, axis=-1, keepdims=True))
    probs = e * pl.reciprocal(jnp.sum(e, axis=-1, keepdims=True), approx=True)

    # TODO(synk): the reference's einsum 'bqk,bvd->bqd' degenerates to a
    # probs-independent sum over values (likely a typo); standard attention
    # 'bqk,bkd->bqd' is implemented here, as in the validated JAX reference.
    attn_out = jnp.dot(probs, v, preferred_element_type=jnp.float32)           # (S, E)

    # ---- residual + feed-forward + norm2 (dropout = identity in eval) ----
    x1 = x + attn_out
    hf = jnp.maximum(jnp.dot(x1, wit_ref[...],
                             preferred_element_type=jnp.float32) + bi, 0.0)
    ff = jnp.dot(hf, wot_ref[...], preferred_element_type=jnp.float32) + bo
    out_ref[0] = _ln(x1 + ff, g2, bt2)


def transformer_encoder_layer_ga(x, consts):
    B, S, E = x.shape

    def const_spec(a):
        n = a.ndim
        return pl.BlockSpec(a.shape, lambda b, n=n: (0,) * n)

    in_specs = [pl.BlockSpec((1, S, E), lambda b: (b, 0, 0))]
    in_specs += [const_spec(a) for a in consts]
    out_spec = pl.BlockSpec((1, S, E), lambda b: (b, 0, 0))

    # TODO(synk): for large batches, tile several sequences per grid step
    # ((Bt, S, E) blocks) to amortize the ~0.35us/step overhead; at B=2 one
    # sequence per "parallel" step keeps both v7x TensorCores busy.
    return pl.pallas_call(
        encoder_layer_kernel,
        out_shape=jax.ShapeDtypeStruct((B, S, E), jnp.float32),
        grid=(B,),
        in_specs=in_specs,
        out_specs=out_spec,
        compiler_params=pltpu.CompilerParams(dimension_semantics=("parallel",)),
    )(x, *consts)


if __name__ == "__main__":
    B, S, E, H = 2, 8, 8, 32          # batch, seq_length, embed_dim (= 2^3 blades), hidden_dim
    NSUB = 4
    subspace_sizes = np.array([1, 3, 3, 1])   # Cl(3,0) grade dimensions

    key = jax.random.PRNGKey(0)
    ks = jax.random.split(key, 24)
    normal = lambda k, shape, std=1.0: std * jax.random.normal(k, shape, dtype=jnp.float32)

    cayley = build_cayley_cl3()                                     # (E, E, E)

    # MVLinear weights: (out_seq, in_seq, n_subspaces) expanded over blades
    wq_sub = normal(ks[0], (S, S, NSUB), 1.0 / math.sqrt(S))
    wk_sub = normal(ks[1], (S, S, NSUB), 1.0 / math.sqrt(S))
    expand = lambda w: jnp.repeat(w, subspace_sizes, axis=-1, total_repeat_length=E)
    wq_full = expand(wq_sub)                                        # (S, S, E)
    wk_full = expand(wk_sub)
    q_bias = normal(ks[2], (S,), 0.02)
    k_bias = normal(ks[3], (S,), 0.02)
    qb_emb = jnp.zeros((S, E), jnp.float32).at[:, 0].set(q_bias)    # embed in scalar blade
    kb_emb = jnp.zeros((S, E), jnp.float32).at[:, 0].set(k_bias)

    def ln_params(k):
        k1, k2 = jax.random.split(k)
        return 1.0 + normal(k1, (1, E), 0.1), normal(k2, (1, E), 0.1)

    ggp, bgp = ln_params(ks[4])      # gp_layer.normalization
    g1, bt1 = ln_params(ks[5])       # norm1
    g2, bt2 = ln_params(ks[6])       # norm2

    # nn.Linear weights stored PyTorch-style (out, in)
    wv = normal(ks[7], (E, E), 1.0 / math.sqrt(E));  bv = normal(ks[8], (1, E), 0.02)
    w1 = normal(ks[9], (H, E), 1.0 / math.sqrt(E));  b1 = normal(ks[10], (1, H), 0.02)
    w2 = normal(ks[11], (H, H), 1.0 / math.sqrt(H)); b2 = normal(ks[12], (1, H), 0.02)
    w3 = normal(ks[13], (1, H), 1.0 / math.sqrt(H)); b3 = normal(ks[14], (1, 1), 0.02)
    wi = normal(ks[15], (H, E), 1.0 / math.sqrt(E)); bi = normal(ks[16], (1, H), 0.02)
    wo = normal(ks[17], (E, H), 1.0 / math.sqrt(H)); bo = normal(ks[18], (1, E), 0.02)

    x = normal(ks[19], (B, S, E))

    # ---- consolidated / pre-packed kernel constants ----
    bf16 = jnp.bfloat16
    # stacked q/k MVLinear weights, flattened so row (p*S+n)*S + m = w_p[n, m, :]
    w2d = jnp.stack([wq_full, wk_full], axis=0).reshape(2 * S * S, E)      # (2*S*S, E)
    # 0/1 segment-sum matrix: qk = Rsum @ (w2d * tiled(xn))
    rsum = jnp.kron(jnp.eye(2 * S, dtype=jnp.float32),
                    jnp.ones((1, S), jnp.float32))                         # (2S, 2S*S)
    qkb = jnp.concatenate([qb_emb, kb_emb], axis=0)                        # (2S, E)
    # flattened Cayley table: ccat[l, i*E + j] = C[i, j, l]   (bf16 for MXU)
    ccat = jnp.transpose(cayley, (2, 0, 1)).reshape(E, E * E).astype(bf16)
    eye = jnp.eye(S, dtype=jnp.float32)
    tsel = jnp.tile(eye, (S, 1))                       # (S*S, S) pair -> key col
    rsel_t = jnp.repeat(eye, S, axis=0).T              # (S, S*S) query-group sum
    vec_e = jnp.concatenate([g1, bt1, ggp, bgp, g2, bt2, bv, bo], axis=0)  # (8, E)
    vec_h = jnp.concatenate([b1, b2, bi], axis=0)                          # (3, H)

    consts = [
        w2d, rsum, qkb, ccat, tsel, rsel_t,
        wv.T, w1.T.astype(bf16), w2.T.astype(bf16), w3.T.astype(bf16),
        wi.T, wo.T, vec_e, vec_h,
    ]

    out = jax.block_until_ready(transformer_encoder_layer_ga(x, consts))

    # ---- pure-JAX reference for validation (mirrors the module's fp16
    # autocast on the geometric product and score MLP via bf16 rounding) ----
    f32 = jnp.float32
    r16 = lambda t: t.astype(bf16).astype(f32)

    def ln_ref(y, g, b):
        mu = y.mean(-1, keepdims=True)
        var = ((y - mu) ** 2).mean(-1, keepdims=True)
        return (y - mu) / jnp.sqrt(var + 1e-5) * g + b

    xn = ln_ref(x, g1, bt1)
    v = xn @ wv.T + bv
    q = ln_ref(jnp.einsum('bmi,nmi->bni', xn, wq_full) + qb_emb[None], ggp, bgp)
    kk = ln_ref(jnp.einsum('bmi,nmi->bni', xn, wk_full) + kb_emb[None], ggp, bgp)
    mv = jnp.einsum('bmi,ijk,bnk->bmnj', r16(q), r16(cayley), r16(kk))
    h = jax.nn.relu(r16(mv) @ r16(w1.T) + b1)
    h = jax.nn.relu(r16(h) @ r16(w2.T) + b2)
    scores = (r16(h) @ r16(w3.T) + b3)[..., 0]
    probs = jax.nn.softmax(scores, axis=-1)
    attn = jnp.einsum('bqk,bkd->bqd', probs, v)
    x1 = x + attn
    ff = jax.nn.relu(x1 @ wi.T + bi) @ wo.T + bo
    ref = ln_ref(x1 + ff, g2, bt2)

    np.testing.assert_allclose(np.asarray(out), np.asarray(ref), rtol=2e-2, atol=2e-2)
    print("KERNEL_OK")
</pallas_src>

<mosaic_0001>
module attributes {stable_mosaic.version = 11 : i64} {
  func.func @encoder_layer_kernel(%arg0: i32, %arg1: memref<1x8x8xf32, #tpu.memory_space<vmem>>, %arg2: memref<128x8xf32, #tpu.memory_space<vmem>>, %arg3: memref<16x128xf32, #tpu.memory_space<vmem>>, %arg4: memref<16x8xf32, #tpu.memory_space<vmem>>, %arg5: memref<8x64xbf16, #tpu.memory_space<vmem>>, %arg6: memref<64x8xf32, #tpu.memory_space<vmem>>, %arg7: memref<8x64xf32, #tpu.memory_space<vmem>>, %arg8: memref<8x8xf32, #tpu.memory_space<vmem>>, %arg9: memref<8x32xbf16, #tpu.memory_space<vmem>>, %arg10: memref<32x32xbf16, #tpu.memory_space<vmem>>, %arg11: memref<32x1xbf16, #tpu.memory_space<vmem>>, %arg12: memref<8x32xf32, #tpu.memory_space<vmem>>, %arg13: memref<32x8xf32, #tpu.memory_space<vmem>>, %arg14: memref<8x8xf32, #tpu.memory_space<vmem>>, %arg15: memref<3x32xf32, #tpu.memory_space<vmem>>, %arg16: memref<1x8x8xf32, #tpu.memory_space<vmem>>) attributes {dimension_semantics = [#tpu.dimension_semantics<parallel>], iteration_bounds = array<i64: 2>, scalar_prefetch = 0 : i64, scratch_operands = 0 : i64, tpu.core_type = #tpu.core_type<tc>, window_params = [{transform_indices = @transform_0, window_bounds = array<i64: 1, 8, 8>}, {pipeline_mode = #tpu.pipeline_mode<synchronous>, transform_indices = @transform_1, window_bounds = array<i64: 128, 8>}, {pipeline_mode = #tpu.pipeline_mode<synchronous>, transform_indices = @transform_2, window_bounds = array<i64: 16, 128>}, {pipeline_mode = #tpu.pipeline_mode<synchronous>, transform_indices = @transform_3, window_bounds = array<i64: 16, 8>}, {pipeline_mode = #tpu.pipeline_mode<synchronous>, transform_indices = @transform_4, window_bounds = array<i64: 8, 64>}, {pipeline_mode = #tpu.pipeline_mode<synchronous>, transform_indices = @transform_5, window_bounds = array<i64: 64, 8>}, {pipeline_mode = #tpu.pipeline_mode<synchronous>, transform_indices = @transform_6, window_bounds = array<i64: 8, 64>}, {pipeline_mode = #tpu.pipeline_mode<synchronous>, transform_indices = @transform_7, window_bounds = array<i64: 8, 8>}, {pipeline_mode = #tpu.pipeline_mode<synchronous>, transform_indices = @transform_8, window_bounds = array<i64: 8, 32>}, {pipeline_mode = #tpu.pipeline_mode<synchronous>, transform_indices = @transform_9, window_bounds = array<i64: 32, 32>}, {pipeline_mode = #tpu.pipeline_mode<synchronous>, transform_indices = @transform_10, window_bounds = array<i64: 32, 1>}, {pipeline_mode = #tpu.pipeline_mode<synchronous>, transform_indices = @transform_11, window_bounds = array<i64: 8, 32>}, {pipeline_mode = #tpu.pipeline_mode<synchronous>, transform_indices = @transform_12, window_bounds = array<i64: 32, 8>}, {pipeline_mode = #tpu.pipeline_mode<synchronous>, transform_indices = @transform_13, window_bounds = array<i64: 8, 8>}, {pipeline_mode = #tpu.pipeline_mode<synchronous>, transform_indices = @transform_14, window_bounds = array<i64: 3, 32>}, {transform_indices = @transform_15, window_bounds = array<i64: 1, 8, 8>}]} {
    %c0 = arith.constant 0 : index
    %c0_0 = arith.constant 0 : index
    %c0_1 = arith.constant 0 : index
    %0 = vector.load %arg1[%c0, %c0_0, %c0_1] : memref<1x8x8xf32, #tpu.memory_space<vmem>>, vector<1x8x8xf32>
    %1 = vector.shape_cast %0 : vector<1x8x8xf32> to vector<8x8xf32>
    %c0_2 = arith.constant 0 : index
    %c0_3 = arith.constant 0 : index
    %2 = vector.load %arg14[%c0_2, %c0_3] : memref<8x8xf32, #tpu.memory_space<vmem>>, vector<8x8xf32>
    %3 = vector.extract_strided_slice %2 {offsets = [0, 0], sizes = [1, 8], strides = [1, 1]} : vector<8x8xf32> to vector<1x8xf32>
    %4 = vector.extract_strided_slice %2 {offsets = [1, 0], sizes = [1, 8], strides = [1, 1]} : vector<8x8xf32> to vector<1x8xf32>
    %5 = vector.extract_strided_slice %2 {offsets = [2, 0], sizes = [1, 8], strides = [1, 1]} : vector<8x8xf32> to vector<1x8xf32>
    %6 = vector.extract_strided_slice %2 {offsets = [3, 0], sizes = [1, 8], strides = [1, 1]} : vector<8x8xf32> to vector<1x8xf32>
    %7 = vector.extract_strided_slice %2 {offsets = [4, 0], sizes = [1, 8], strides = [1, 1]} : vector<8x8xf32> to vector<1x8xf32>
    %8 = vector.extract_strided_slice %2 {offsets = [5, 0], sizes = [1, 8], strides = [1, 1]} : vector<8x8xf32> to vector<1x8xf32>
    %9 = vector.extract_strided_slice %2 {offsets = [6, 0], sizes = [1, 8], strides = [1, 1]} : vector<8x8xf32> to vector<1x8xf32>
    %10 = vector.extract_strided_slice %2 {offsets = [7, 0], sizes = [1, 8], strides = [1, 1]} : vector<8x8xf32> to vector<1x8xf32>
    %c0_4 = arith.constant 0 : index
    %c0_5 = arith.constant 0 : index
    %11 = vector.load %arg15[%c0_4, %c0_5] : memref<3x32xf32, #tpu.memory_space<vmem>>, vector<3x32xf32>
    %12 = vector.extract_strided_slice %11 {offsets = [0, 0], sizes = [1, 32], strides = [1, 1]} : vector<3x32xf32> to vector<1x32xf32>
    %13 = vector.extract_strided_slice %11 {offsets = [1, 0], sizes = [1, 32], strides = [1, 1]} : vector<3x32xf32> to vector<1x32xf32>
    %14 = vector.extract_strided_slice %11 {offsets = [2, 0], sizes = [1, 32], strides = [1, 1]} : vector<3x32xf32> to vector<1x32xf32>
    %cst = arith.constant dense<0.000000e+00> : vector<8xf32>
    %15 = vector.multi_reduction <add>, %1, %cst [1] : vector<8x8xf32> to vector<8xf32>
    %16 = vector.shape_cast %15 : vector<8xf32> to vector<8x1xf32>
    %cst_6 = arith.constant 8.000000e+00 : f32
    %17 = vector.broadcast %cst_6 : f32 to vector<8x1xf32>
    %18 = arith.divf %16, %17 : vector<8x1xf32>
    %19 = vector.broadcast %18 : vector<8x1xf32> to vector<8x8xf32>
    %20 = arith.subf %1, %19 : vector<8x8xf32>
    %21 = arith.mulf %20, %20 : vector<8x8xf32>
    %cst_7 = arith.constant dense<0.000000e+00> : vector<8xf32>
    %22 = vector.multi_reduction <add>, %21, %cst_7 [1] : vector<8x8xf32> to vector<8xf32>
    %23 = vector.shape_cast %22 : vector<8xf32> to vector<8x1xf32>
    %cst_8 = arith.constant 8.000000e+00 : f32
    %24 = vector.broadcast %cst_8 : f32 to vector<8x1xf32>
    %25 = arith.divf %23, %24 : vector<8x1xf32>
    %26 = vector.broadcast %18 : vector<8x1xf32> to vector<8x8xf32>
    %27 = arith.subf %1, %26 : vector<8x8xf32>
    %cst_9 = arith.constant 9.99999974E-6 : f32
    %28 = vector.broadcast %cst_9 : f32 to vector<8x1xf32>
    %29 = arith.addf %25, %28 : vector<8x1xf32>
    %30 = math.rsqrt %29 : vector<8x1xf32>
    %31 = vector.broadcast %30 : vector<8x1xf32> to vector<8x8xf32>
    %32 = arith.mulf %27, %31 : vector<8x8xf32>
    %33 = vector.broadcast %3 : vector<1x8xf32> to vector<8x8xf32>
    %34 = arith.mulf %32, %33 : vector<8x8xf32>
    %35 = vector.broadcast %4 : vector<1x8xf32> to vector<8x8xf32>
    %36 = arith.addf %34, %35 : vector<8x8xf32>
    %c0_10 = arith.constant 0 : index
    %c0_11 = arith.constant 0 : index
    %37 = vector.load %arg8[%c0_10, %c0_11] : memref<8x8xf32, #tpu.memory_space<vmem>>, vector<8x8xf32>
    %cst_12 = arith.constant dense<0.000000e+00> : vector<8x8xf32>
    %38 = tpu.matmul %36, %37, %cst_12 {dimension_numbers = #tpu.dot_dimension_numbers<[1], [0], [0], [1], [0, 0, 1, 1], [], []>} : vector<8x8xf32>, vector<8x8xf32>, vector<8x8xf32> -> vector<8x8xf32>
    %39 = vector.broadcast %9 : vector<1x8xf32> to vector<8x8xf32>
    %40 = arith.addf %38, %39 : vector<8x8xf32>
    %41 = tpu.concatenate %36, %36, %36, %36, %36, %36, %36, %36, %36, %36, %36, %36, %36, %36, %36, %36 in 0 : vector<8x8xf32>, vector<8x8xf32>, vector<8x8xf32>, vector<8x8xf32>, vector<8x8xf32>, vector<8x8xf32>, vector<8x8xf32>, vector<8x8xf32>, vector<8x8xf32>, vector<8x8xf32>, vector<8x8xf32>, vector<8x8xf32>, vector<8x8xf32>, vector<8x8xf32>, vector<8x8xf32>, vector<8x8xf32> -> vector<128x8xf32>
    %c0_13 = arith.constant 0 : index
    %c0_14 = arith.constant 0 : index
    %42 = vector.load %arg3[%c0_13, %c0_14] : memref<16x128xf32, #tpu.memory_space<vmem>>, vector<16x128xf32>
    %c0_15 = arith.constant 0 : index
    %c0_16 = arith.constant 0 : index
    %43 = vector.load %arg2[%c0_15, %c0_16] : memref<128x8xf32, #tpu.memory_space<vmem>>, vector<128x8xf32>
    %44 = arith.mulf %43, %41 : vector<128x8xf32>
    %cst_17 = arith.constant dense<0.000000e+00> : vector<16x8xf32>
    %45 = tpu.matmul %42, %44, %cst_17 {dimension_numbers = #tpu.dot_dimension_numbers<[1], [0], [0], [1], [0, 0, 1, 1], [], []>} : vector<16x128xf32>, vector<128x8xf32>, vector<16x8xf32> -> vector<16x8xf32>
    %c0_18 = arith.constant 0 : index
    %c0_19 = arith.constant 0 : index
    %46 = vector.load %arg4[%c0_18, %c0_19] : memref<16x8xf32, #tpu.memory_space<vmem>>, vector<16x8xf32>
    %47 = arith.addf %45, %46 : vector<16x8xf32>
    %cst_20 = arith.constant dense<0.000000e+00> : vector<16xf32>
    %48 = vector.multi_reduction <add>, %47, %cst_20 [1] : vector<16x8xf32> to vector<16xf32>
    %49 = vector.shape_cast %48 : vector<16xf32> to vector<16x1xf32>
    %cst_21 = arith.constant 8.000000e+00 : f32
    %50 = vector.broadcast %cst_21 : f32 to vector<16x1xf32>
    %51 = arith.divf %49, %50 : vector<16x1xf32>
    %52 = vector.broadcast %51 : vector<16x1xf32> to vector<16x8xf32>
    %53 = arith.subf %47, %52 : vector<16x8xf32>
    %54 = arith.mulf %53, %53 : vector<16x8xf32>
    %cst_22 = arith.constant dense<0.000000e+00> : vector<16xf32>
    %55 = vector.multi_reduction <add>, %54, %cst_22 [1] : vector<16x8xf32> to vector<16xf32>
    %56 = vector.shape_cast %55 : vector<16xf32> to vector<16x1xf32>
    %cst_23 = arith.constant 8.000000e+00 : f32
    %57 = vector.broadcast %cst_23 : f32 to vector<16x1xf32>
    %58 = arith.divf %56, %57 : vector<16x1xf32>
    %59 = vector.broadcast %51 : vector<16x1xf32> to vector<16x8xf32>
    %60 = arith.subf %47, %59 : vector<16x8xf32>
    %cst_24 = arith.constant 9.99999974E-6 : f32
    %61 = vector.broadcast %cst_24 : f32 to vector<16x1xf32>
    %62 = arith.addf %58, %61 : vector<16x1xf32>
    %63 = math.rsqrt %62 : vector<16x1xf32>
    %64 = vector.broadcast %63 : vector<16x1xf32> to vector<16x8xf32>
    %65 = arith.mulf %60, %64 : vector<16x8xf32>
    %66 = vector.broadcast %5 : vector<1x8xf32> to vector<16x8xf32>
    %67 = arith.mulf %65, %66 : vector<16x8xf32>
    %68 = vector.broadcast %6 : vector<1x8xf32> to vector<16x8xf32>
    %69 = arith.addf %67, %68 : vector<16x8xf32>
    %70 = vector.extract_strided_slice %69 {offsets = [0, 0], sizes = [8, 8], strides = [1, 1]} : vector<16x8xf32> to vector<8x8xf32>
    %71 = arith.truncf %70 : vector<8x8xf32> to vector<8x8xbf16>
    %72 = arith.extf %71 : vector<8x8xbf16> to vector<8x8xf32>
    %73 = vector.extract_strided_slice %69 {offsets = [8, 0], sizes = [8, 8], strides = [1, 1]} : vector<16x8xf32> to vector<8x8xf32>
    %74 = arith.truncf %73 : vector<8x8xf32> to vector<8x8xbf16>
    %75 = arith.extf %74 : vector<8x8xbf16> to vector<8x8xf32>
    %76 = vector.extract_strided_slice %72 {offsets = [0, 0], sizes = [1, 8], strides = [1, 1]} : vector<8x8xf32> to vector<1x8xf32>
    %77 = vector.shape_cast %76 : vector<1x8xf32> to vector<1x8xf32>
    %78 = vector.broadcast %77 : vector<1x8xf32> to vector<8x8xf32>
    %79 = vector.extract_strided_slice %72 {offsets = [1, 0], sizes = [1, 8], strides = [1, 1]} : vector<8x8xf32> to vector<1x8xf32>
    %80 = vector.shape_cast %79 : vector<1x8xf32> to vector<1x8xf32>
    %81 = vector.broadcast %80 : vector<1x8xf32> to vector<8x8xf32>
    %82 = vector.extract_strided_slice %72 {offsets = [2, 0], sizes = [1, 8], strides = [1, 1]} : vector<8x8xf32> to vector<1x8xf32>
    %83 = vector.shape_cast %82 : vector<1x8xf32> to vector<1x8xf32>
    %84 = vector.broadcast %83 : vector<1x8xf32> to vector<8x8xf32>
    %85 = vector.extract_strided_slice %72 {offsets = [3, 0], sizes = [1, 8], strides = [1, 1]} : vector<8x8xf32> to vector<1x8xf32>
    %86 = vector.shape_cast %85 : vector<1x8xf32> to vector<1x8xf32>
    %87 = vector.broadcast %86 : vector<1x8xf32> to vector<8x8xf32>
    %88 = vector.extract_strided_slice %72 {offsets = [4, 0], sizes = [1, 8], strides = [1, 1]} : vector<8x8xf32> to vector<1x8xf32>
    %89 = vector.shape_cast %88 : vector<1x8xf32> to vector<1x8xf32>
    %90 = vector.broadcast %89 : vector<1x8xf32> to vector<8x8xf32>
    %91 = vector.extract_strided_slice %72 {offsets = [5, 0], sizes = [1, 8], strides = [1, 1]} : vector<8x8xf32> to vector<1x8xf32>
    %92 = vector.shape_cast %91 : vector<1x8xf32> to vector<1x8xf32>
    %93 = vector.broadcast %92 : vector<1x8xf32> to vector<8x8xf32>
    %94 = vector.extract_strided_slice %72 {offsets = [6, 0], sizes = [1, 8], strides = [1, 1]} : vector<8x8xf32> to vector<1x8xf32>
    %95 = vector.shape_cast %94 : vector<1x8xf32> to vector<1x8xf32>
    %96 = vector.broadcast %95 : vector<1x8xf32> to vector<8x8xf32>
    %97 = vector.extract_strided_slice %72 {offsets = [7, 0], sizes = [1, 8], strides = [1, 1]} : vector<8x8xf32> to vector<1x8xf32>
    %98 = vector.shape_cast %97 : vector<1x8xf32> to vector<1x8xf32>
    %99 = vector.broadcast %98 : vector<1x8xf32> to vector<8x8xf32>
    %100 = tpu.concatenate %78, %81, %84, %87, %90, %93, %96, %99 in 0 : vector<8x8xf32>, vector<8x8xf32>, vector<8x8xf32>, vector<8x8xf32>, vector<8x8xf32>, vector<8x8xf32>, vector<8x8xf32>, vector<8x8xf32> -> vector<64x8xf32>
    %101 = tpu.concatenate %75, %75, %75, %75, %75, %75, %75, %75 in 0 : vector<8x8xf32>, vector<8x8xf32>, vector<8x8xf32>, vector<8x8xf32>, vector<8x8xf32>, vector<8x8xf32>, vector<8x8xf32>, vector<8x8xf32> -> vector<64x8xf32>
    %102 = arith.truncf %101 : vector<64x8xf32> to vector<64x8xbf16>
    %c0_25 = arith.constant 0 : index
    %c0_26 = arith.constant 0 : index
    %103 = vector.load %arg5[%c0_25, %c0_26] : memref<8x64xbf16, #tpu.memory_space<vmem>>, vector<8x64xbf16>
    %cst_27 = arith.constant dense<0.000000e+00> : vector<64x64xf32>
    %104 = tpu.matmul %102, %103, %cst_27 {dimension_numbers = #tpu.dot_dimension_numbers<[1], [0], [0], [1], [0, 0, 1, 1], [], []>} : vector<64x8xbf16>, vector<8x64xbf16>, vector<64x64xf32> -> vector<64x64xf32>
    %cst_28 = arith.constant 0.000000e+00 : f32
    %105 = vector.broadcast %cst_28 : f32 to vector<64x8xf32>
    %106 = vector.extract_strided_slice %100 {offsets = [0, 0], sizes = [64, 1], strides = [1, 1]} : vector<64x8xf32> to vector<64x1xf32>
    %107 = vector.extract_strided_slice %104 {offsets = [0, 0], sizes = [64, 8], strides = [1, 1]} : vector<64x64xf32> to vector<64x8xf32>
    %108 = vector.broadcast %106 : vector<64x1xf32> to vector<64x8xf32>
    %109 = arith.mulf %108, %107 : vector<64x8xf32>
    %110 = arith.addf %105, %109 : vector<64x8xf32>
    %111 = vector.extract_strided_slice %100 {offsets = [0, 1], sizes = [64, 1], strides = [1, 1]} : vector<64x8xf32> to vector<64x1xf32>
    %112 = vector.extract_strided_slice %104 {offsets = [0, 8], sizes = [64, 8], strides = [1, 1]} : vector<64x64xf32> to vector<64x8xf32>
    %113 = vector.broadcast %111 : vector<64x1xf32> to vector<64x8xf32>
    %114 = arith.mulf %113, %112 : vector<64x8xf32>
    %115 = arith.addf %110, %114 : vector<64x8xf32>
    %116 = vector.extract_strided_slice %100 {offsets = [0, 2], sizes = [64, 1], strides = [1, 1]} : vector<64x8xf32> to vector<64x1xf32>
    %117 = vector.extract_strided_slice %104 {offsets = [0, 16], sizes = [64, 8], strides = [1, 1]} : vector<64x64xf32> to vector<64x8xf32>
    %118 = vector.broadcast %116 : vector<64x1xf32> to vector<64x8xf32>
    %119 = arith.mulf %118, %117 : vector<64x8xf32>
    %120 = arith.addf %115, %119 : vector<64x8xf32>
    %121 = vector.extract_strided_slice %100 {offsets = [0, 3], sizes = [64, 1], strides = [1, 1]} : vector<64x8xf32> to vector<64x1xf32>
    %122 = vector.extract_strided_slice %104 {offsets = [0, 24], sizes = [64, 8], strides = [1, 1]} : vector<64x64xf32> to vector<64x8xf32>
    %123 = vector.broadcast %121 : vector<64x1xf32> to vector<64x8xf32>
    %124 = arith.mulf %123, %122 : vector<64x8xf32>
    %125 = arith.addf %120, %124 : vector<64x8xf32>
    %126 = vector.extract_strided_slice %100 {offsets = [0, 4], sizes = [64, 1], strides = [1, 1]} : vector<64x8xf32> to vector<64x1xf32>
    %127 = vector.extract_strided_slice %104 {offsets = [0, 32], sizes = [64, 8], strides = [1, 1]} : vector<64x64xf32> to vector<64x8xf32>
    %128 = vector.broadcast %126 : vector<64x1xf32> to vector<64x8xf32>
    %129 = arith.mulf %128, %127 : vector<64x8xf32>
    %130 = arith.addf %125, %129 : vector<64x8xf32>
    %131 = vector.extract_strided_slice %100 {offsets = [0, 5], sizes = [64, 1], strides = [1, 1]} : vector<64x8xf32> to vector<64x1xf32>
    %132 = vector.extract_strided_slice %104 {offsets = [0, 40], sizes = [64, 8], strides = [1, 1]} : vector<64x64xf32> to vector<64x8xf32>
    %133 = vector.broadcast %131 : vector<64x1xf32> to vector<64x8xf32>
    %134 = arith.mulf %133, %132 : vector<64x8xf32>
    %135 = arith.addf %130, %134 : vector<64x8xf32>
    %136 = vector.extract_strided_slice %100 {offsets = [0, 6], sizes = [64, 1], strides = [1, 1]} : vector<64x8xf32> to vector<64x1xf32>
    %137 = vector.extract_strided_slice %104 {offsets = [0, 48], sizes = [64, 8], strides = [1, 1]} : vector<64x64xf32> to vector<64x8xf32>
    %138 = vector.broadcast %136 : vector<64x1xf32> to vector<64x8xf32>
    %139 = arith.mulf %138, %137 : vector<64x8xf32>
    %140 = arith.addf %135, %139 : vector<64x8xf32>
    %141 = vector.extract_strided_slice %100 {offsets = [0, 7], sizes = [64, 1], strides = [1, 1]} : vector<64x8xf32> to vector<64x1xf32>
    %142 = vector.extract_strided_slice %104 {offsets = [0, 56], sizes = [64, 8], strides = [1, 1]} : vector<64x64xf32> to vector<64x8xf32>
    %143 = vector.broadcast %141 : vector<64x1xf32> to vector<64x8xf32>
    %144 = arith.mulf %143, %142 : vector<64x8xf32>
    %145 = arith.addf %140, %144 : vector<64x8xf32>
    %146 = arith.truncf %145 : vector<64x8xf32> to vector<64x8xbf16>
    %c0_29 = arith.constant 0 : index
    %c0_30 = arith.constant 0 : index
    %147 = vector.load %arg9[%c0_29, %c0_30] : memref<8x32xbf16, #tpu.memory_space<vmem>>, vector<8x32xbf16>
    %cst_31 = arith.constant dense<0.000000e+00> : vector<64x32xf32>
    %148 = tpu.matmul %146, %147, %cst_31 {dimension_numbers = #tpu.dot_dimension_numbers<[1], [0], [0], [1], [0, 0, 1, 1], [], []>} : vector<64x8xbf16>, vector<8x32xbf16>, vector<64x32xf32> -> vector<64x32xf32>
    %149 = vector.broadcast %12 : vector<1x32xf32> to vector<64x32xf32>
    %150 = arith.addf %148, %149 : vector<64x32xf32>
    %cst_32 = arith.constant 0.000000e+00 : f32
    %151 = vector.broadcast %cst_32 : f32 to vector<64x32xf32>
    %152 = arith.maximumf %150, %151 : vector<64x32xf32>
    %153 = arith.truncf %152 : vector<64x32xf32> to vector<64x32xbf16>
    %c0_33 = arith.constant 0 : index
    %c0_34 = arith.constant 0 : index
    %154 = vector.load %arg10[%c0_33, %c0_34] : memref<32x32xbf16, #tpu.memory_space<vmem>>, vector<32x32xbf16>
    %cst_35 = arith.constant dense<0.000000e+00> : vector<64x32xf32>
    %155 = tpu.matmul %153, %154, %cst_35 {dimension_numbers = #tpu.dot_dimension_numbers<[1], [0], [0], [1], [0, 0, 1, 1], [], []>} : vector<64x32xbf16>, vector<32x32xbf16>, vector<64x32xf32> -> vector<64x32xf32>
    %156 = vector.broadcast %13 : vector<1x32xf32> to vector<64x32xf32>
    %157 = arith.addf %155, %156 : vector<64x32xf32>
    %cst_36 = arith.constant 0.000000e+00 : f32
    %158 = vector.broadcast %cst_36 : f32 to vector<64x32xf32>
    %159 = arith.maximumf %157, %158 : vector<64x32xf32>
    %160 = arith.truncf %159 : vector<64x32xf32> to vector<64x32xbf16>
    %c0_37 = arith.constant 0 : index
    %c0_38 = arith.constant 0 : index
    %161 = vector.load %arg11[%c0_37, %c0_38] : memref<32x1xbf16, #tpu.memory_space<vmem>>, vector<32x1xbf16>
    %cst_39 = arith.constant dense<0.000000e+00> : vector<64x1xf32>
    %162 = tpu.matmul %160, %161, %cst_39 {dimension_numbers = #tpu.dot_dimension_numbers<[1], [0], [0], [1], [0, 0, 1, 1], [], []>} : vector<64x32xbf16>, vector<32x1xbf16>, vector<64x1xf32> -> vector<64x1xf32>
    %c0_40 = arith.constant 0 : index
    %c0_41 = arith.constant 0 : index
    %163 = vector.load %arg7[%c0_40, %c0_41] : memref<8x64xf32, #tpu.memory_space<vmem>>, vector<8x64xf32>
    %c0_42 = arith.constant 0 : index
    %c0_43 = arith.constant 0 : index
    %164 = vector.load %arg6[%c0_42, %c0_43] : memref<64x8xf32, #tpu.memory_space<vmem>>, vector<64x8xf32>
    %165 = vector.broadcast %162 : vector<64x1xf32> to vector<64x8xf32>
    %166 = arith.mulf %165, %164 : vector<64x8xf32>
    %cst_44 = arith.constant dense<0.000000e+00> : vector<8x8xf32>
    %167 = tpu.matmul %163, %166, %cst_44 {dimension_numbers = #tpu.dot_dimension_numbers<[1], [0], [0], [1], [0, 0, 1, 1], [], []>} : vector<8x64xf32>, vector<64x8xf32>, vector<8x8xf32> -> vector<8x8xf32>
    %cst_45 = arith.constant dense<0xFF800000> : vector<8xf32>
    %168 = vector.multi_reduction <maximumf>, %167, %cst_45 [1] : vector<8x8xf32> to vector<8xf32>
    %169 = vector.shape_cast %168 : vector<8xf32> to vector<8x1xf32>
    %170 = vector.broadcast %169 : vector<8x1xf32> to vector<8x8xf32>
    %171 = arith.subf %167, %170 : vector<8x8xf32>
    %172 = math.exp %171 : vector<8x8xf32>
    %cst_46 = arith.constant dense<0.000000e+00> : vector<8xf32>
    %173 = vector.multi_reduction <add>, %172, %cst_46 [1] : vector<8x8xf32> to vector<8xf32>
    %174 = vector.shape_cast %173 : vector<8xf32> to vector<8x1xf32>
    %175 = tpu.reciprocal %174 {approx = true} : vector<8x1xf32> -> vector<8x1xf32>
    %176 = vector.broadcast %175 : vector<8x1xf32> to vector<8x8xf32>
    %177 = arith.mulf %172, %176 : vector<8x8xf32>
    %cst_47 = arith.constant dense<0.000000e+00> : vector<8x8xf32>
    %178 = tpu.matmul %177, %40, %cst_47 {dimension_numbers = #tpu.dot_dimension_numbers<[1], [0], [0], [1], [0, 0, 1, 1], [], []>} : vector<8x8xf32>, vector<8x8xf32>, vector<8x8xf32> -> vector<8x8xf32>
    %179 = arith.addf %1, %178 : vector<8x8xf32>
    %c0_48 = arith.constant 0 : index
    %c0_49 = arith.constant 0 : index
    %180 = vector.load %arg12[%c0_48, %c0_49] : memref<8x32xf32, #tpu.memory_space<vmem>>, vector<8x32xf32>
    %cst_50 = arith.constant dense<0.000000e+00> : vector<8x32xf32>
    %181 = tpu.matmul %179, %180, %cst_50 {dimension_numbers = #tpu.dot_dimension_numbers<[1], [0], [0], [1], [0, 0, 1, 1], [], []>} : vector<8x8xf32>, vector<8x32xf32>, vector<8x32xf32> -> vector<8x32xf32>
    %182 = vector.broadcast %14 : vector<1x32xf32> to vector<8x32xf32>
    %183 = arith.addf %181, %182 : vector<8x32xf32>
    %cst_51 = arith.constant 0.000000e+00 : f32
    %184 = vector.broadcast %cst_51 : f32 to vector<8x32xf32>
    %185 = arith.maximumf %183, %184 : vector<8x32xf32>
    %c0_52 = arith.constant 0 : index
    %c0_53 = arith.constant 0 : index
    %186 = vector.load %arg13[%c0_52, %c0_53] : memref<32x8xf32, #tpu.memory_space<vmem>>, vector<32x8xf32>
    %cst_54 = arith.constant dense<0.000000e+00> : vector<8x8xf32>
    %187 = tpu.matmul %185, %186, %cst_54 {dimension_numbers = #tpu.dot_dimension_numbers<[1], [0], [0], [1], [0, 0, 1, 1], [], []>} : vector<8x32xf32>, vector<32x8xf32>, vector<8x8xf32> -> vector<8x8xf32>
    %188 = vector.broadcast %10 : vector<1x8xf32> to vector<8x8xf32>
    %189 = arith.addf %187, %188 : vector<8x8xf32>
    %190 = arith.addf %179, %189 : vector<8x8xf32>
    %cst_55 = arith.constant dense<0.000000e+00> : vector<8xf32>
    %191 = vector.multi_reduction <add>, %190, %cst_55 [1] : vector<8x8xf32> to vector<8xf32>
    %192 = vector.shape_cast %191 : vector<8xf32> to vector<8x1xf32>
    %cst_56 = arith.constant 8.000000e+00 : f32
    %193 = vector.broadcast %cst_56 : f32 to vector<8x1xf32>
    %194 = arith.divf %192, %193 : vector<8x1xf32>
    %195 = vector.broadcast %194 : vector<8x1xf32> to vector<8x8xf32>
    %196 = arith.subf %190, %195 : vector<8x8xf32>
    %197 = arith.mulf %196, %196 : vector<8x8xf32>
    %cst_57 = arith.constant dense<0.000000e+00> : vector<8xf32>
    %198 = vector.multi_reduction <add>, %197, %cst_57 [1] : vector<8x8xf32> to vector<8xf32>
    %199 = vector.shape_cast %198 : vector<8xf32> to vector<8x1xf32>
    %cst_58 = arith.constant 8.000000e+00 : f32
    %200 = vector.broadcast %cst_58 : f32 to vector<8x1xf32>
    %201 = arith.divf %199, %200 : vector<8x1xf32>
    %202 = vector.broadcast %194 : vector<8x1xf32> to vector<8x8xf32>
    %203 = arith.subf %190, %202 : vector<8x8xf32>
    %cst_59 = arith.constant 9.99999974E-6 : f32
    %204 = vector.broadcast %cst_59 : f32 to vector<8x1xf32>
    %205 = arith.addf %201, %204 : vector<8x1xf32>
    %206 = math.rsqrt %205 : vector<8x1xf32>
    %207 = vector.broadcast %206 : vector<8x1xf32> to vector<8x8xf32>
    %208 = arith.mulf %203, %207 : vector<8x8xf32>
    %209 = vector.broadcast %7 : vector<1x8xf32> to vector<8x8xf32>
    %210 = arith.mulf %208, %209 : vector<8x8xf32>
    %211 = vector.broadcast %8 : vector<1x8xf32> to vector<8x8xf32>
    %212 = arith.addf %210, %211 : vector<8x8xf32>
    %c0_60 = arith.constant 0 : index
    %c0_61 = arith.constant 0 : index
    %c0_62 = arith.constant 0 : index
    %213 = vector.load %arg16[%c0_60, %c0_61, %c0_62] : memref<1x8x8xf32, #tpu.memory_space<vmem>>, vector<1x8x8xf32>
    %214 = vector.shape_cast %213 : vector<1x8x8xf32> to vector<8x8xf32>
    %215 = vector.shape_cast %212 : vector<8x8xf32> to vector<1x8x8xf32>
    tpu.vector_store %arg16[%c0_60, %c0_61, %c0_62], %215 {strides = array<i32>} : memref<1x8x8xf32, #tpu.memory_space<vmem>>, vector<1x8x8xf32>,
    return
  }
  func.func @transform_0(%arg0: i32) -> (i32, i32, i32) {
    %c0_i32 = arith.constant 0 : i32
    %c0_i32_0 = arith.constant 0 : i32
    %c0_i32_1 = arith.constant 0 : i32
    return %arg0, %c0_i32, %c0_i32_0 : i32, i32, i32
  }
  func.func @transform_1(%arg0: i32) -> (i32, i32) {
    %c0_i32 = arith.constant 0 : i32
    %c0_i32_0 = arith.constant 0 : i32
    %c0_i32_1 = arith.constant 0 : i32
    return %c0_i32, %c0_i32_0 : i32, i32
  }
  func.func @transform_2(%arg0: i32) -> (i32, i32) {
    %c0_i32 = arith.constant 0 : i32
    %c0_i32_0 = arith.constant 0 : i32
    %c0_i32_1 = arith.constant 0 : i32
    return %c0_i32, %c0_i32_0 : i32, i32
  }
  func.func @transform_3(%arg0: i32) -> (i32, i32) {
    %c0_i32 = arith.constant 0 : i32
    %c0_i32_0 = arith.constant 0 : i32
    %c0_i32_1 = arith.constant 0 : i32
    return %c0_i32, %c0_i32_0 : i32, i32
  }
  func.func @transform_4(%arg0: i32) -> (i32, i32) {
    %c0_i32 = arith.constant 0 : i32
    %c0_i32_0 = arith.constant 0 : i32
    %c0_i32_1 = arith.constant 0 : i32
    return %c0_i32, %c0_i32_0 : i32, i32
  }
  func.func @transform_5(%arg0: i32) -> (i32, i32) {
    %c0_i32 = arith.constant 0 : i32
    %c0_i32_0 = arith.constant 0 : i32
    %c0_i32_1 = arith.constant 0 : i32
    return %c0_i32, %c0_i32_0 : i32, i32
  }
  func.func @transform_6(%arg0: i32) -> (i32, i32) {
    %c0_i32 = arith.constant 0 : i32
    %c0_i32_0 = arith.constant 0 : i32
    %c0_i32_1 = arith.constant 0 : i32
    return %c0_i32, %c0_i32_0 : i32, i32
  }
  func.func @transform_7(%arg0: i32) -> (i32, i32) {
    %c0_i32 = arith.constant 0 : i32
    %c0_i32_0 = arith.constant 0 : i32
    %c0_i32_1 = arith.constant 0 : i32
    return %c0_i32, %c0_i32_0 : i32, i32
  }
  func.func @transform_8(%arg0: i32) -> (i32, i32) {
    %c0_i32 = arith.constant 0 : i32
    %c0_i32_0 = arith.constant 0 : i32
    %c0_i32_1 = arith.constant 0 : i32
    return %c0_i32, %c0_i32_0 : i32, i32
  }
  func.func @transform_9(%arg0: i32) -> (i32, i32) {
    %c0_i32 = arith.constant 0 : i32
    %c0_i32_0 = arith.constant 0 : i32
    %c0_i32_1 = arith.constant 0 : i32
    return %c0_i32, %c0_i32_0 : i32, i32
  }
  func.func @transform_10(%arg0: i32) -> (i32, i32) {
    %c0_i32 = arith.constant 0 : i32
    %c0_i32_0 = arith.constant 0 : i32
    %c0_i32_1 = arith.constant 0 : i32
    return %c0_i32, %c0_i32_0 : i32, i32
  }
  func.func @transform_11(%arg0: i32) -> (i32, i32) {
    %c0_i32 = arith.constant 0 : i32
    %c0_i32_0 = arith.constant 0 : i32
    %c0_i32_1 = arith.constant 0 : i32
    return %c0_i32, %c0_i32_0 : i32, i32
  }
  func.func @transform_12(%arg0: i32) -> (i32, i32) {
    %c0_i32 = arith.constant 0 : i32
    %c0_i32_0 = arith.constant 0 : i32
    %c0_i32_1 = arith.constant 0 : i32
    return %c0_i32, %c0_i32_0 : i32, i32
  }
  func.func @transform_13(%arg0: i32) -> (i32, i32) {
    %c0_i32 = arith.constant 0 : i32
    %c0_i32_0 = arith.constant 0 : i32
    %c0_i32_1 = arith.constant 0 : i32
    return %c0_i32, %c0_i32_0 : i32, i32
  }
  func.func @transform_14(%arg0: i32) -> (i32, i32) {
    %c0_i32 = arith.constant 0 : i32
    %c0_i32_0 = arith.constant 0 : i32
    %c0_i32_1 = arith.constant 0 : i32
    return %c0_i32, %c0_i32_0 : i32, i32
  }
  func.func @transform_15(%arg0: i32) -> (i32, i32, i32) {
    %c0_i32 = arith.constant 0 : i32
    %c0_i32_0 = arith.constant 0 : i32
    %c0_i32_1 = arith.constant 0 : i32
    return %arg0, %c0_i32, %c0_i32_0 : i32, i32, i32
  }
}

</mosaic_0001>

<bundles_post_ra>
// kernel: tpu_custom_call.1
= control target key start
LH: loop header
LB: loop body
LE: loop exit
PB: predicated region body
PF: predicated region fallthrough
CT: control target
= control target key end

     0   :  { %s3521_s0 = inlined_call_operand.vmem [shape: f32[2,8,8], index: 0, kind: input, shape index: {}]   ;;  %s3522_s1 = inlined_call_operand.vmem [shape: f32[128,8], index: 1, kind: input, shape index: {}]   ;;  %s3523_s2 = inlined_call_operand.vmem [shape: f32[16,128], index: 2, kind: input, shape index: {}]   ;;  %s3524_s3 = inlined_call_operand.vmem [shape: f32[16,8], index: 3, kind: input, shape index: {}]   ;;  %s3525_s4 = inlined_call_operand.vmem [shape: bf16[8,64], index: 4, kind: input, shape index: {}]   ;;  %s3526_s5 = inlined_call_operand.vmem [shape: f32[64,8], index: 5, kind: input, shape index: {}]   ;;  %s3527_s6 = inlined_call_operand.vmem [shape: f32[8,64], index: 6, kind: input, shape index: {}]   ;;  %s3528_s7 = inlined_call_operand.vmem [shape: f32[8,8], index: 7, kind: input, shape index: {}]   ;;  %s3529_s8 = inlined_call_operand.vmem [shape: bf16[8,32], index: 8, kind: input, shape index: {}]   ;;  %s3530_s9 = inlined_call_operand.vmem [shape: bf16[32,32], index: 9, kind: input, shape index: {}]   ;;  %s3531_s10 = inlined_call_operand.vmem [shape: bf16[32,1], index: 10, kind: input, shape index: {}]   ;;  %s3532_s11 = inlined_call_operand.vmem [shape: f32[8,32], index: 11, kind: input, shape index: {}]   ;;  %s3533_s12 = inlined_call_operand.vmem [shape: f32[32,8], index: 12, kind: input, shape index: {}]   ;;  %s3534_s13 = inlined_call_operand.vmem [shape: f32[8,8], index: 13, kind: input, shape index: {}]   ;;  %s3535_s14 = inlined_call_operand.vmem [shape: f32[3,32], index: 14, kind: input, shape index: {}]   ;;  %s3536_s15 = inlined_call_operand.hbm [shape: f32[2,8,8], index: 15, kind: output, shape index: {}]  }
   0x1   :  { %3540 = sst [smem:[#allocation8_spill]] %s3521_s0 }
   0x2   :  { %3541 = sst [smem:[#allocation9_spill]] %s3528_s7 }
   0x3   :  { %20 = vsyncpa [#allocation3], 0 }
   0x4   :  { %22 = vsyncpa [#allocation3 + $0x1], 0  ;;  %s2943_s18 = smov 0   ;;  %s2945_s19 = smov 0  }
   0x5   :  { %s2947_s20 = smov 0   ;;  %s2949_s21 = smov 0  }
   0x6 LB: > { %3542 = sst [smem:[#allocation5_spill]] %s2838_s20  ;;  %s2964_s22 = sadd.s32 4294967295, %s2842_s21   ;;  %s2842_s21 = sphi %s2949_s21, %s3549_s21   ;;  %s2838_s20 = sphi %s2947_s20, %s3551_s20   ;;  %s2834_s19 = sphi %s2945_s19, %s3553_s19   ;;  %s2830_s18 = sphi %s2943_s18, %s3552_s18  }
   0x7   : > { %s2250_s23 = sadd.s32 4294967294, %s2842_s21   ;;  %s2968_s24 = sadd.s32 1, %s2842_s21  }
   0x8   : > { %3543 = sst [smem:[#allocation6_spill]] %s2968_s24  ;;  %s355_s25 = sadd.s32 1, %s2838_s20 }
   0x9   : > { %s352_s26 = ssub.s32 %s2842_s21, %s2968_s24  ;;  %p365_p0 = scmp.ne.s32.totalorder %s2838_s20, %s2834_s19 }
   0xa   : > { %p353_p1 = scmp.eq.s32.totalorder %s352_s26, 0  ;;  %p366_p2 = scmp.eq.s32.totalorder %s2964_s22, 1 }
   0xb   : > { %p371_p3 = scmp.ne.s32.totalorder %s2834_s19, %s2830_s18  ;;  %p372_p4 = scmp.eq.s32.totalorder %s2250_s23, 1 }
   0xc   : > { %s2979_s27 = scalar_select %p353_p1, %s2838_s20, %s355_s25  }
   0xd   : > { %p2981_p5 = por %p366_p2, %p365_p0  ;;  %p2985_p6 = por %p372_p4, %p371_p3 }
   0xe   : > { %3544 = sst [smem:[#allocation7_spill]] %s2979_s27  ;;  %p2253_p7 = scmp.ge.s32.totalorder %s2842_s21, 1 }
   0xf   : > { %p439_p8 = scmp.lt.s32.totalorder %s2842_s21, 3 }
  0x11   : > { %p440_p9 = pnand %p2253_p7, %p439_p8 }
  0x12   : > { %p486_p10 = scmp.lt.s32.totalorder (!%p440_p9), %s2964_s22, 1  ;;  %vm494_vm0 = vcmask (!%p440_p9), 64512   ;;  %s3547_s0 = sld [smem:[#allocation8_spill]] (!%p440_p9)  ;;  %v2844_v7 = vmov (!%p440_p9), 0.0   ;;  %vm2845_vm1 = vmmov (!%p440_p9), 0   ;;  %v509_v11 = vlaneseq (!%p440_p9)  ;;  %v3015_v15 = vld [vmem:[%s3534_s13] sm:$0xff] (!%p440_p9) }
  0x13   : > { %443 = sbr.rel (%p440_p9) target bundleno = 3650 (0xe42), region = 80  ;;  %2345 = vmatprep.subr.mxu1 (!%p440_p9), %v2844_v7  ;;  %s3548_s7 = sld [smem:[#allocation9_spill]] (!%p440_p9)  ;;  %2347 = vmatprep.mubr.msk.f32.mxu1 (!%p440_p9), %vm2845_vm1, %v2844_v7  ;;  %v599_v22 = vld [vmem:[%s3522_s1] sm:$0xff] (!%p440_p9)  ;;  %v600_v23 = vld [vmem:[%s3522_s1 + $0x8] sm:$0xff] (!%p440_p9)  ;;  %v601_v24 = vld [vmem:[%s3522_s1 + $0x10] sm:$0xff] (!%p440_p9)  ;;  %vm787_vm2 = vcmask (!%p440_p9), 1043456  }
  0x14   : > { %v3007_v13 = vshrl.u32 (!%p440_p9), %v509_v11, 7  ;;  %v602_v25 = vld [vmem:[%s3522_s1 + $0x18] sm:$0xff] (!%p440_p9)  ;;  %v597_v27 = vld [vmem:[%s3523_s2] sm:$0xff] (!%p440_p9)  ;;  %v604_v33 = vld [vmem:[%s3522_s1 + $0x28] sm:$0xff] (!%p440_p9)  ;;  %s2857_s20 = smov (!%p440_p9), 96   ;;  %s2858_s24 = smov (!%p440_p9), 88  }
  0x15   : > { %v603_v32 = vld [vmem:[%s3522_s1 + $0x20] sm:$0xff] (!%p440_p9)  ;;  %v605_v38 = vld [vmem:[%s3522_s1 + $0x30] sm:$0xff] (!%p440_p9)  ;;  %v606_v39 = vld [vmem:[%s3522_s1 + $0x38] sm:$0xff] (!%p440_p9)  ;;  %s2859_s27 = smov (!%p440_p9), 80   ;;  %vm1593_vm3 = vcmask (!%p440_p9), 261120   ;;  %vm1833_vm4 = vcmask (!%p440_p9), 523264  }
  0x16   : > { %v3010_v14 = vsub.s32 (!%p440_p9), 0, %v3007_v13  ;;  %v3018_v16 = vsub.s32 (!%p440_p9), 1, %v3007_v13  ;;  %v607_v43 = vld [vmem:[%s3522_s1 + $0x40] sm:$0xff] (!%p440_p9)  ;;  %v608_v44 = vld [vmem:[%s3522_s1 + $0x48] sm:$0xff] (!%p440_p9)  ;;  %v609_v48 = vld [vmem:[%s3522_s1 + $0x50] sm:$0xff] (!%p440_p9) }
  0x17   : > { %v610_v49 = vld [vmem:[%s3522_s1 + $0x58] sm:$0xff] (!%p440_p9)  ;;  %v611_v53 = vld [vmem:[%s3522_s1 + $0x60] sm:$0xff] (!%p440_p9)  ;;  %v612_v54 = vld [vmem:[%s3522_s1 + $0x68] sm:$0xff] (!%p440_p9) }
  0x18   : > { %v512_v17 = vrot.slane (!%p440_p9), %v3015_v15, %v3010_v14  ;;  %v517_v19 = vrot.slane (!%p440_p9), %v3015_v15, %v3018_v16  ;;  %v613_v58 = vld [vmem:[%s3522_s1 + $0x70] sm:$0xff] (!%p440_p9)  ;;  %v614_v59 = vld [vmem:[%s3522_s1 + $0x78] sm:$0xff] (!%p440_p9) }
  0x19   : > { %v519_v8 = vld [vmem:[%s3548_s7] sm:$0xff] (!%p440_p9)  ;;  %s2856_s7 = smov (!%p440_p9), 104  }
  0x1a   : > { %s487_s30 = scalar_select %p486_p10, %s2964_s22, 1  ;;  %2346 = vmatpush3.msra.mxu1 %v519_v8 }
  0x1c   : > { %s2255_s16 = sshll.u32 %s487_s30, 3  ;;  %s2855_s30 = smov 112  }
  0x1d   : > { %s2996_s25 = scalar_lea.vmem %s3547_s0, %s2255_s16  ;;  %s2854_s0 = smov 120  }
  0x1e   : > { %v491_v0 = vld [vmem:[%s2996_s25] sm:$0xff]  ;;  %s2860_s16 = smov 72  }
  0x1f   : > { %v495_v1 = vsel %vm494_vm0, %v491_v0, 0.0 }
  0x20   : > { %496 = vadd.xlane.f32.xlu0 %v495_v1 }
  0xad   : > { %v497_v2 = vpop.xlane.xlu0 %496 }
  0xae   : > { %v499_v3 = vmul.f32 0.125, %v497_v2 }
  0xb0   : > { %v500_v4 = vsub.f32 %v491_v0, %v499_v3  ;;  %v598_v0 = vld [vmem:[%s3523_s2 + $0x8] sm:$0xff] }
  0xb1   : > { %v632_v3 = vld [vmem:[%s3524_s3 + $0x8] sm:$0xff] }
  0xb2   : > { %v501_v5 = vmul.f32 %v500_v4, %v500_v4 }
  0xb4   : > { %v502_v6 = vsel %vm494_vm0, %v501_v5, 0.0 }
  0xb5   : > { %503 = vadd.xlane.f32.xlu0 %v502_v6 }
 0x142   : > { %v504_v9 = vpop.xlane.xlu0 %503 }
 0x143   : > { %v505_v10 = vmul.f32 0.125, %v504_v9 }
 0x145   : > { %v506_v12 = vadd.f32 1e-05, %v505_v10 }
 0x147   : > { %2766 = vrsqrt.f32 %v506_v12 }
 0x151   : > { %v2767_v18 = vpop.eup %2766 }
 0x152   : > { %v508_v20 = vmul.f32 %v2767_v18, %v500_v4  ;;  %v631_v4 = vld [vmem:[%s3524_s3] sm:$0xff] }
 0x154   : > { %v513_v21 = vmul.f32 %v512_v17, %v508_v20 }
 0x156   : > { %v518_v26 = vadd.f32 %v517_v19, %v513_v21 }
 0x158   : > { %2348 = vmatmul.mubr.msk.f32.vlgmr.msra.gmra.mrb[0].mxu1 %vm494_vm0, %v518_v26  ;;  %v615_v28 = vmul.f32 %v599_v22, %v518_v26  ;;  %v616_v29 = vmul.f32 %v600_v23, %v518_v26  ;;  %v617_v30 = vmul.f32 %v601_v24, %v518_v26  ;;  %v618_v31 = vmul.f32 %v602_v25, %v518_v26 }
 0x159   : > { %2382 = vmatprep.mubr.f32.mxu1 %v597_v27  ;;  %v619_v36 = vmul.f32 %v603_v32, %v518_v26  ;;  %v620_v37 = vmul.f32 %v604_v33, %v518_v26  ;;  %v621_v41 = vmul.f32 %v605_v38, %v518_v26  ;;  %v622_v42 = vmul.f32 %v606_v39, %v518_v26 }
 0x15a   : > { %v2469_v34 = vpack.c.bf16 %v616_v29, %v615_v28  ;;  %v2473_v35 = vpack.c.bf16 %v618_v31, %v617_v30  ;;  %v623_v46 = vmul.f32 %v607_v43, %v518_v26  ;;  %v624_v47 = vmul.f32 %v608_v44, %v518_v26 }
 0x15b   : > { %v2477_v40 = vpack.c.bf16 %v620_v37, %v619_v36  ;;  %v2481_v45 = vpack.c.bf16 %v622_v42, %v621_v41  ;;  %v625_v51 = vmul.f32 %v609_v48, %v518_v26  ;;  %v626_v52 = vmul.f32 %v610_v49, %v518_v26 }
 0x15c   : > { %2470 = vmatprep.subr.bf16.mxu1 %v2469_v34  ;;  %v2485_v50 = vpack.c.bf16 %v624_v47, %v623_v46  ;;  %v627_v56 = vmul.f32 %v611_v53, %v518_v26  ;;  %v628_v57 = vmul.f32 %v612_v54, %v518_v26  ;;  %v629_v61 = vmul.f32 %v613_v58, %v518_v26 }
 0x15d   : > { %2472 = vmatpush3.bf16.msra.mxu1 %v2469_v34  ;;  %v2489_v55 = vpack.c.bf16 %v626_v52, %v625_v51  ;;  %v630_v62 = vmul.f32 %v614_v59, %v518_v26  ;;  %v783_v26 = vld [vmem:[%s3525_s4] sm:$0xf]  ;;  %v2846_v28 = vmov 1   ;;  %v742_v36 = vsub.s32 3, %v3007_v13 }
 0x15e   : > { %2474 = vmatprep.subr.bf16.mxu1 %v2473_v35  ;;  %v2493_v60 = vpack.c.bf16 %v628_v57, %v627_v56  ;;  %2519 = vmatprep.subr.msk.bf16.mxu0 %vm787_vm2, %v783_v26  ;;  %v789_v27 = vsel %vm787_vm2, %v783_v26, 0  ;;  %v768_v48 = vsub.s32 4, %v3007_v13  ;;  %v772_v49 = vsub.s32 5, %v3007_v13 }
 0x15f   : > { %v2497_v63 = vpack.c.bf16 %v630_v62, %v629_v61  ;;  %2386 = vmatpush3.bf16.msra.mxu0 %v789_v27  ;;  %2584 = vset.pattern.permute.xlu1 %v2846_v28  ;;  %v780_v53 = vsub.s32 7, %v3007_v13  ;;  %v522_v56 = vsub.s32 6, %v3007_v13  ;;  %v2847_v61 = vmov 2  }
 0x160   : > { %2578 = vset.pattern.permute.xlu0 %v2846_v28  ;;  %v2848_v62 = vmov 5  }
 0x161   : > { %2476 = vmatpush3.bf16.msra.mxu1 %v2473_v35  ;;  %v3099_v35 = vsub.s32 2, %v3007_v13 }
 0x162   : > { %2478 = vmatprep.subr.bf16.mxu1 %v2477_v40 }
 0x163   : > { %v737_v37 = vrot.slane %v3015_v15, %v3099_v35 }
 0x165   : > { %2480 = vmatpush3.bf16.msra.mxu1 %v2477_v40  ;;  %v743_v40 = vrot.slane %v3015_v15, %v742_v36 }
 0x166   : > { %2482 = vmatprep.subr.bf16.mxu1 %v2481_v45 }
 0x169   : > { %2484 = vmatpush3.bf16.msra.mxu1 %v2481_v45 }
 0x16a   : > { %2486 = vmatprep.subr.bf16.mxu1 %v2485_v50 }
 0x16d   : > { %2488 = vmatpush3.bf16.msra.mxu1 %v2485_v50 }
 0x16e   : > { %2490 = vmatprep.subr.bf16.mxu1 %v2489_v55 }
 0x171   : > { %2492 = vmatpush3.bf16.msra.mxu1 %v2489_v55 }
 0x172   : > { %2494 = vmatprep.subr.bf16.mxu1 %v2493_v60 }
 0x175   : > { %2496 = vmatpush3.bf16.msra.mxu1 %v2493_v60 }
 0x176   : > { %2498 = vmatprep.subr.bf16.mxu1 %v2497_v63 }
 0x179   : > { %2500 = vmatpush3.bf16.msra.mxu1 %v2497_v63 }
 0x17c   : > { %2383 = vmatmul.mubr.f32.vlgmr.msra.gmra.mrb[2].mxu1 %v598_v0 }
 0x22b   : > { %v3079_v1 = vpop.f32.mrb[0].mxu1 }
 0x22c   : > { %v2349_v2 = vpop.f32.mrb[1].mxu1 }
 0x22d   : > { %v2849_v2 = vmov 3  }
 0x24f   : > { %v2384_v5 = vpop.f32.mrb[2].mxu1 }
 0x250   : > { %v705_v6 = vadd.f32 %v2384_v5, %v632_v3  ;;  %v699_v8 = vpop.f32.mrb[3].mxu1  ;;  %v2850_v3 = vmov 6   ;;  %v2852_v5 = vmov 7  }
 0x251   : > { %v700_v9 = vadd.f32 %v699_v8, %v631_v4  ;;  %v2851_v4 = vmov 4  }
 0x252   : > { %v711_v10 = vsel %vm494_vm0, %v705_v6, 0.0 }
 0x253   : > { %712 = vadd.xlane.f32.xlu1 %v711_v10  ;;  %v708_v11 = vsel %vm494_vm0, %v700_v9, 0.0 }
 0x254   : > { %709 = vadd.xlane.f32.xlu0 %v708_v11 }
 0x2e0   : > { %v713_v12 = vpop.xlane.xlu1 %712 }
 0x2e1   : > { %v715_v17 = vmul.f32 0.125, %v713_v12  ;;  %v710_v18 = vpop.xlane.xlu0 %709 }
 0x2e2   : > { %v714_v19 = vmul.f32 0.125, %v710_v18 }
 0x2e3   : > { %v717_v20 = vsub.f32 %v705_v6, %v715_v17  ;;  %v2853_v6 = vmov 0  }
 0x2e4   : > { %v716_v21 = vsub.f32 %v700_v9, %v714_v19 }
 0x2e5   : > { %v719_v22 = vmul.f32 %v717_v20, %v717_v20 }
 0x2e6   : > { %v718_v24 = vmul.f32 %v716_v21, %v716_v21 }
 0x2e7   : > { %v723_v23 = vsel %vm494_vm0, %v719_v22, 0.0 }
 0x2e8   : > { %724 = vadd.xlane.f32.xlu1 %v723_v23  ;;  %v720_v25 = vsel %vm494_vm0, %v718_v24, 0.0 }
 0x2ec   : > { %721 = vadd.xlane.f32.xlu1 %v720_v25 }
 0x375   : > { %v725_v29 = vpop.xlane.xlu1 %724 }
 0x376   : > { %v727_v30 = vmul.f32 0.125, %v725_v29 }
 0x378   : > { %v729_v31 = vadd.f32 1e-05, %v727_v30 }
 0x379   : > { %v722_v32 = vpop.xlane.xlu1 %721 }
 0x37a   : > { %2768 = vrsqrt.f32 %v729_v31  ;;  %v726_v33 = vmul.f32 0.125, %v722_v32 }
 0x37c   : > { %v728_v34 = vadd.f32 1e-05, %v726_v33 }
 0x37e   : > { %2770 = vrsqrt.f32 %v728_v34 }
 0x384   : > { %v2769_v38 = vpop.eup %2768 }
 0x385   : > { %v733_v39 = vmul.f32 %v2769_v38, %v717_v20 }
 0x387   : > { %v739_v41 = vmul.f32 %v737_v37, %v733_v39 }
 0x388   : > { %v2771_v42 = vpop.eup %2770 }
 0x389   : > { %v732_v43 = vmul.f32 %v2771_v42, %v716_v21  ;;  %v745_v44 = vadd.f32 %v743_v40, %v739_v41 }
 0x38b   : > { %v738_v45 = vmul.f32 %v737_v37, %v732_v43  ;;  %v782_v46 = vpack.c.bf16 %v745_v44, %v745_v44 }
 0x38d   : > { %v744_v47 = vadd.f32 %v743_v40, %v738_v45  ;;  %2387 = vmatprep.mubr.msk.bf16.mxu0 %vm494_vm0, %v782_v46 }
 0x38e   : > { %2388 = vmatmul.mubr.msk.bf16.vlgmr.msra.gmra.mrb[0].mxu0 %vm494_vm0, %v782_v46 }
 0x38f   : > { %2391 = vmatprep.mubr.msk.bf16.mxu0 %vm494_vm0, %v782_v46  ;;  %v761_v50 = vrot.slane %v744_v47, %v3099_v35  ;;  %v765_v15 = vrot.slane %v744_v47, %v742_v36  ;;  %v753_v51 = vrot.slane %v744_v47, %v3010_v14  ;;  %v757_v52 = vrot.slane %v744_v47, %v3018_v16 }
 0x390   : > { %v769_v57 = vrot.slane %v744_v47, %v768_v48  ;;  %v773_v58 = vrot.slane %v744_v47, %v772_v49  ;;  %v777_v59 = vrot.slane %v744_v47, %v522_v56  ;;  %v781_v60 = vrot.slane %v744_v47, %v780_v53 }
 0x391   : > { %v3114_v54 = vpack.i.bf16 %v765_v15, %v761_v50  ;;  %v3116_v55 = vpack.i.bf16 %v757_v52, %v753_v51 }
 0x392   : > { %v2706_v63 = vpack.i.bf16 %v773_v58, %v769_v57  ;;  %v2723_v0 = vpack.i.bf16 %v781_v60, %v777_v59 }
 0x393   : > { %2586 = vperm.xlu1 %2584, %v3114_v54   ;;  %2580 = vperm.xlu0 %2578, %v3116_v55  }
 0x396   : > { %2392 = vmatmul.mubr.msk.bf16.gmra.mrb[4].mxu0 %vm494_vm0, %v782_v46 }
 0x397   : > { %2590 = vset.pattern.permute.xlu1 %v2847_v61  ;;  %2629 = vset.pattern.permute.xlu0 %v2848_v62 }
 0x398   : > { %2592 = vperm.xlu1 %2590, %v3116_v55   ;;  %2631 = vperm.xlu0 %2629, %v3116_v55  }
 0x39c   : > { %2597 = vperm.xlu1 %2590, %v3114_v54   ;;  %2646 = vset.pattern.permute.xlu0 %v2847_v61 }
 0x39d   : > { %2648 = vperm.xlu0 %2646, %v2706_v63  }
 0x3a0   : > { %2601 = vset.pattern.permute.xlu1 %v2849_v2 }
 0x3a1   : > { %2603 = vperm.xlu1 %2601, %v3116_v55   ;;  %2664 = vset.pattern.permute.xlu0 %v2850_v3 }
 0x3a2   : > { %2666 = vperm.xlu0 %2664, %v3114_v54  }
 0x3a5   : > { %2608 = vperm.xlu1 %2601, %v3114_v54  }
 0x3a6   : > { %2682 = vset.pattern.permute.xlu0 %v2849_v2 }
 0x3a7   : > { %2684 = vperm.xlu0 %2682, %v2723_v0  }
 0x3a9   : > { %2612 = vset.pattern.permute.xlu1 %v2851_v4 }
 0x3aa   : > { %2614 = vperm.xlu1 %2612, %v3116_v55  }
 0x3ab   : > { %2699 = vset.pattern.permute.xlu0 %v2851_v4 }
 0x3ac   : > { %2701 = vperm.xlu0 %2699, %v2723_v0  }
 0x3ae   : > { %2619 = vperm.xlu1 %2612, %v3114_v54  }
 0x3b0   : > { %2716 = vset.pattern.permute.xlu0 %v2850_v3 }
 0x3b1   : > { %2718 = vperm.xlu0 %2716, %v2706_v63  }
 0x3b2   : > { %2623 = vset.pattern.permute.xlu1 %v2846_v28 }
 0x3b3   : > { %2625 = vperm.xlu1 %2623, %v2706_v63  }
 0x3b5   : > { %2734 = vset.pattern.permute.xlu0 %v2852_v5 }
 0x3b6   : > { %2736 = vperm.xlu0 %2734, %v2723_v0  }
 0x3b7   : > { %2636 = vperm.xlu1 %2623, %v2723_v0  }
 0x3ba   : > { %2751 = vset.pattern.permute.xlu0 %v2853_v6 }
 0x3bb   : > { %2640 = vset.pattern.permute.xlu1 %v2848_v62  ;;  %2753 = vperm.xlu0 %2751, %v2706_v63  }
 0x3bc   : > { %2642 = vperm.xlu1 %2640, %v3114_v54  }
 0x3c0   : > { %2652 = vset.pattern.permute.xlu1 %v2850_v3 }
 0x3c1   : > { %2654 = vperm.xlu1 %2652, %v3116_v55  }
 0x3c5   : > { %2658 = vset.pattern.permute.xlu1 %v2847_v61 }
 0x3c6   : > { %2660 = vperm.xlu1 %2658, %v2723_v0  }
 0x3ca   : > { %2670 = vset.pattern.permute.xlu1 %v2849_v2 }
 0x3cb   : > { %2672 = vperm.xlu1 %2670, %v2706_v63  }
 0x3cf   : > { %2676 = vset.pattern.permute.xlu1 %v2852_v5 }
 0x3d0   : > { %2678 = vperm.xlu1 %2676, %v3116_v55  }
 0x3d4   : > { %2689 = vperm.xlu1 %2676, %v3114_v54  }
 0x3d8   : > { %2693 = vset.pattern.permute.xlu1 %v2851_v4 }
 0x3d9   : > { %2695 = vperm.xlu1 %2693, %v2706_v63  }
 0x3dd   : > { %2705 = vset.pattern.permute.xlu1 %v2848_v62 }
 0x3de   : > { %2707 = vperm.xlu1 %2705, %v2706_v63  }
 0x3e2   : > { %2712 = vperm.xlu1 %2705, %v2723_v0  }
 0x3e6   : > { %2722 = vset.pattern.permute.xlu1 %v2850_v3 }
 0x3e7   : > { %2724 = vperm.xlu1 %2722, %v2723_v0  }
 0x3eb   : > { %2728 = vset.pattern.permute.xlu1 %v2852_v5 }
 0x3ec   : > { %2730 = vperm.xlu1 %2728, %v2706_v63  }
 0x3f0   : > { %2740 = vset.pattern.permute.xlu1 %v2853_v6 }
 0x3f1   : > { %2742 = vperm.xlu1 %2740, %v3116_v55  }
 0x3f5   : > { %2747 = vperm.xlu1 %2740, %v3114_v54  }
 0x3f9   : > { %2758 = vperm.xlu1 %2740, %v2723_v0  }
 0x412   : > { %v2587_v8 = vpop.permute.xlu1 %2586  ;;  %v3155_v22 = vpop.permute.xlu0 %2580 }
 0x413   : > { %v2588_v24 = vunpack.i.l.bf16 %v2587_v8  ;;  %v2589_v26 = vunpack.i.h.bf16 %v2587_v8 }
 0x417   : > { %v3145_v9 = vpop.permute.xlu1 %2592  ;;  %v3161_v27 = vpop.permute.xlu0 %2631 }
 0x41b   : > { %v2598_v10 = vpop.permute.xlu1 %2597 }
 0x41c   : > { %v2599_v32 = vunpack.i.l.bf16 %v2598_v10  ;;  %v2600_v36 = vunpack.i.h.bf16 %v2598_v10  ;;  %v2649_v38 = vpop.permute.xlu0 %2648 }
 0x41d   : > { %v2651_v46 = vunpack.i.h.bf16 %v2649_v38  ;;  %v2650_v15 = vunpack.i.l.bf16 %v2649_v38  ;;  %v2594_v38 = vunpack.i.l.bf16 %v3145_v9 }
 0x420   : > { %v3147_v11 = vpop.permute.xlu1 %2603 }
 0x421   : > { %v2667_v3 = vpop.permute.xlu0 %2666 }
 0x422   : > { %v2668_v6 = vunpack.i.l.bf16 %v2667_v3 }
 0x424   : > { %v2609_v12 = vpop.permute.xlu1 %2608 }
 0x425   : > { %v2610_v39 = vunpack.i.l.bf16 %v2609_v12  ;;  %v2611_v43 = vunpack.i.h.bf16 %v2609_v12  ;;  %v2669_v12 = vunpack.i.h.bf16 %v2667_v3 }
 0x429   : > { %v3149_v17 = vpop.permute.xlu1 %2614 }
 0x42d   : > { %v2620_v18 = vpop.permute.xlu1 %2619 }
 0x42e   : > { %v2621_v47 = vunpack.i.l.bf16 %v2620_v18  ;;  %v2622_v57 = vunpack.i.h.bf16 %v2620_v18 }
 0x432   : > { %v3151_v19 = vpop.permute.xlu1 %2625 }
 0x436   : > { %v3153_v20 = vpop.permute.xlu1 %2636 }
 0x43b   : > { %v2643_v21 = vpop.permute.xlu1 %2642 }
 0x43c   : > { %v2644_v0 = vunpack.i.l.bf16 %v2643_v21  ;;  %v2645_v4 = vunpack.i.h.bf16 %v2643_v21 }
 0x440   : > { %v3157_v23 = vpop.permute.xlu1 %2654 }
 0x445   : > { %v3166_v30 = vpop.permute.xlu1 %2660 }
 0x44a   : > { %v2673_v41 = vpop.permute.xlu1 %2672 }
 0x44b   : > { %v2675_v51 = vunpack.i.h.bf16 %v2673_v41  ;;  %v2674_v52 = vunpack.i.l.bf16 %v2673_v41 }
 0x44f   : > { %v3204_v63 = vpop.permute.xlu1 %2678 }
 0x453   : > { %v2690_v10 = vpop.permute.xlu1 %2689 }
 0x461   : > { %v3159_v25 = vpop.f32.mrb[0].mxu0 }
 0x462   : > { %v3163_v28 = vpop.f32.mrb[1].mxu0  ;;  %v946_v29 = vmul.f32 %v2588_v24, %v3159_v25  ;;  %v1026_v37 = vmul.f32 %v2599_v32, %v3159_v25  ;;  %v1106_v45 = vmul.f32 %v2610_v39, %v3159_v25  ;;  %v1186_v58 = vmul.f32 %v2621_v47, %v3159_v25 }
 0x463   : > { %v3168_v31 = vpop.f32.mrb[2].mxu0  ;;  %v1266_v5 = vmul.f32 %v2644_v0, %v3159_v25  ;;  %v1346_v18 = vmul.f32 %v2668_v6, %v3159_v25  ;;  %v2691_v24 = vunpack.i.l.bf16 %v2690_v10  ;;  %v2582_v32 = vunpack.i.l.bf16 %v3155_v22  ;;  %v3262_v6 = vpop.permute.xlu1 %2695 }
 0x464   : > { %v3170_v33 = vpop.f32.mrb[3].mxu0  ;;  %964 = vrot.lane.b32.xlu1 %v946_v29, %s2854_s0  ;;  %v947_v34 = vmul.f32 %v2589_v26, %v3168_v31  ;;  %v1027_v40 = vmul.f32 %v2600_v36, %v3168_v31  ;;  %v1107_v55 = vmul.f32 %v2611_v43, %v3168_v31  ;;  %v1187_v2 = vmul.f32 %v2622_v57, %v3168_v31 }
 0x465   : > { %v1267_v8 = vmul.f32 %v2645_v4, %v3168_v31  ;;  %v1347_v21 = vmul.f32 %v2669_v12, %v3168_v31  ;;  %v2692_v26 = vunpack.i.h.bf16 %v2690_v10  ;;  %v1426_v29 = vmul.f32 %v2691_v24, %v3159_v25 }
 0x466   : > { %966 = vrot.lane.b32.xlu0 %v947_v34, %s2854_s0  ;;  %v2583_v36 = vunpack.i.h.bf16 %v3155_v22  ;;  %v1024_v41 = vmul.f32 %v2594_v38, %v3163_v28  ;;  %v2605_v43 = vunpack.i.l.bf16 %v3147_v11  ;;  %v2616_v47 = vunpack.i.l.bf16 %v3149_v17 }
 0x467   : > { %v1427_v34 = vmul.f32 %v2692_v26, %v3168_v31  ;;  %v2680_v4 = vunpack.i.l.bf16 %v3204_v63  ;;  %v2708_v26 = vpop.permute.xlu1 %2707 }
 0x468   : > { %1044 = vrot.lane.b32.xlu1 %v1026_v37, %s2855_s30  ;;  %v944_v37 = vmul.f32 %v2582_v32, %v3163_v28  ;;  %v945_v39 = vmul.f32 %v2583_v36, %v3170_v33  ;;  %v2663_v32 = vunpack.i.h.bf16 %v3166_v30 }
 0x469   : > { %v3178_v42 = vpop.f32.mrb[4].mxu0  ;;  %v1424_v10 = vmul.f32 %v2680_v4, %v3163_v28  ;;  %v2709_v4 = vunpack.i.l.bf16 %v2708_v26 }
 0x46a   : > { %v3180_v44 = vpop.f32.mrb[5].mxu0  ;;  %1046 = vrot.lane.b32.xlu0 %v1027_v40, %s2855_s30  ;;  %v2595_v40 = vunpack.i.h.bf16 %v3145_v9 }
 0x46b   : > { %v3184_v50 = vpop.f32.mrb[6].mxu0  ;;  %v3193_v59 = vmul.f32 %v2650_v15, %v3180_v44  ;;  %v3199_v61 = vmul.f32 %v2674_v52, %v3180_v44  ;;  %v2617_v15 = vunpack.i.h.bf16 %v3149_v17  ;;  %v2633_v52 = vunpack.i.l.bf16 %v3161_v27  ;;  %v1476_v17 = vld [vmem:[%s3529_s8] sm:$0xf]  ;;  %v2713_v38 = vpop.permute.xlu1 %2712 }
 0x46c   : > { %v3186_v54 = vpop.f32.mrb[7].mxu0  ;;  %1124 = vrot.lane.b32.xlu1 %v1106_v45, %s2856_s7  ;;  %v1025_v22 = vmul.f32 %v2595_v40, %v3170_v33  ;;  %v2606_v45 = vunpack.i.h.bf16 %v3147_v11  ;;  %2520 = vmatprep.subr.msk.bf16.mxu0 %vm787_vm2, %v1476_v17 }
 0x46d   : > { %v3196_v60 = vmul.f32 %v2651_v46, %v3186_v54  ;;  %v3202_v62 = vmul.f32 %v2675_v51, %v3186_v54  ;;  %v1104_v46 = vmul.f32 %v2605_v43, %v3163_v28  ;;  %v1184_v51 = vmul.f32 %v2616_v47, %v3163_v28 }
 0x46e   : > { %1126 = vrot.lane.b32.xlu0 %v1107_v55, %s2856_s7  ;;  %v1105_v9 = vmul.f32 %v2606_v45, %v3170_v33  ;;  %v1185_v11 = vmul.f32 %v2617_v15, %v3170_v33  ;;  %v2634_v55 = vunpack.i.h.bf16 %v3161_v27  ;;  %v1264_v57 = vmul.f32 %v2633_v52, %v3163_v28 }
 0x46f   : > { %v2657_v27 = vunpack.i.h.bf16 %v3157_v23  ;;  %v2725_v45 = vpop.permute.xlu1 %2724 }
 0x470   : > { %1204 = vrot.lane.b32.xlu1 %v1186_v58, %s2857_s20  ;;  %v2656_v58 = vunpack.i.l.bf16 %v3157_v23  ;;  %v1265_v0 = vmul.f32 %v2634_v55, %v3170_v33  ;;  %v2638_v23 = vunpack.i.l.bf16 %v3153_v20  ;;  %v2726_v15 = vunpack.i.l.bf16 %v2725_v45 }
 0x471   : > { %v2727_v52 = vunpack.i.h.bf16 %v2725_v45 }
 0x472   : > { %1206 = vrot.lane.b32.xlu0 %v1187_v2, %s2857_s20  ;;  %v1494_v2 = vsel %vm787_vm2, %v1476_v17, 0  ;;  %v1344_v3 = vmul.f32 %v2656_v58, %v3163_v28  ;;  %v950_v24 = vmul.f32 %v2638_v23, %v3178_v42  ;;  %v1350_v55 = vmul.f32 %v2726_v15, %v3178_v42 }
 0x473   : > { %2396 = vmatpush3.bf16.msra.mxu0 %v1494_v2  ;;  %v1351_v17 = vmul.f32 %v2727_v52, %v3184_v50  ;;  %v2628_v58 = vunpack.i.h.bf16 %v3151_v19 }
 0x474   : > { %1284 = vrot.lane.b32.xlu1 %v1266_v5, %s2858_s24  ;;  %v1345_v5 = vmul.f32 %v2657_v27, %v3170_v33  ;;  %v2697_v27 = vunpack.i.l.bf16 %v3262_v6 }
 0x475   : > { %v949_v2 = vmul.f32 %v2628_v58, %v3186_v54 }
 0x476   : > { %1286 = vrot.lane.b32.xlu0 %v1267_v8, %s2858_s24  ;;  %v2681_v8 = vunpack.i.h.bf16 %v3204_v63  ;;  %v2662_v63 = vunpack.i.l.bf16 %v3166_v30 }
 0x478   : > { %1364 = vrot.lane.b32.xlu1 %v1346_v18, %s2859_s27  ;;  %v1425_v12 = vmul.f32 %v2681_v8, %v3170_v33  ;;  %v2639_v18 = vunpack.i.h.bf16 %v3153_v20  ;;  %v1031_v20 = vmul.f32 %v2663_v32, %v3184_v50 }
 0x47a   : > { %1366 = vrot.lane.b32.xlu0 %v1347_v21, %s2859_s27  ;;  %v2685_v21 = vpop.permute.xlu0 %2684 }
 0x47b   : > { %v2686_v36 = vunpack.i.l.bf16 %v2685_v21 }
 0x47c   : > { %1444 = vrot.lane.b32.xlu1 %v1426_v29, %s2860_s16  ;;  %v951_v29 = vmul.f32 %v2639_v18, %v3184_v50 }
 0x47d   : > { %v1110_v40 = vmul.f32 %v2686_v36, %v3178_v42 }
 0x47e   : > { %1446 = vrot.lane.b32.xlu0 %v1427_v34, %s2860_s16  ;;  %v1030_v34 = vmul.f32 %v2662_v63, %v3178_v42 }
 0x480   : > { %960 = vrot.lane.b32.xlu1 %v944_v37, %s2854_s0  ;;  %v2702_v37 = vpop.permute.xlu0 %2701 }
 0x481   : > { %v2704_v43 = vunpack.i.h.bf16 %v2702_v37 }
 0x482   : > { %962 = vrot.lane.b32.xlu0 %v945_v39, %s2854_s0  ;;  %v2687_v39 = vunpack.i.h.bf16 %v2685_v21 }
 0x483   : > { %v1191_v47 = vmul.f32 %v2704_v43, %v3184_v50 }
 0x484   : > { %1040 = vrot.lane.b32.xlu1 %v1024_v41, %s2855_s30  ;;  %v2703_v41 = vunpack.i.l.bf16 %v2702_v37  ;;  %v1111_v30 = vmul.f32 %v2687_v39, %v3184_v50  ;;  %v2719_v8 = vpop.permute.xlu0 %2718 }
 0x486   : > { %1042 = vrot.lane.b32.xlu0 %v1025_v22, %s2855_s30  ;;  %v1190_v22 = vmul.f32 %v2703_v41, %v3178_v42 }
 0x488   : > { %1120 = vrot.lane.b32.xlu1 %v1104_v46, %s2856_s7  ;;  %v2714_v46 = vunpack.i.l.bf16 %v2713_v38 }
 0x48a   : > { %1122 = vrot.lane.b32.xlu0 %v1105_v9, %s2856_s7  ;;  %v2715_v9 = vunpack.i.h.bf16 %v2713_v38 }
 0x48c   : > { %1200 = vrot.lane.b32.xlu1 %v1184_v51, %s2857_s20  ;;  %v1270_v51 = vmul.f32 %v2714_v46, %v3178_v42 }
 0x48e   : > { %1202 = vrot.lane.b32.xlu0 %v1185_v11, %s2857_s20  ;;  %v1271_v11 = vmul.f32 %v2715_v9, %v3184_v50 }
 0x490   : > { %1280 = vrot.lane.b32.xlu1 %v1264_v57, %s2858_s24  ;;  %v2627_v57 = vunpack.i.l.bf16 %v3151_v19  ;;  %v2698_v19 = vunpack.i.h.bf16 %v3262_v6 }
 0x492   : > { %1282 = vrot.lane.b32.xlu0 %v1265_v0, %s2858_s24  ;;  %v948_v0 = vmul.f32 %v2627_v57, %v3180_v44 }
 0x494   : > { %1360 = vrot.lane.b32.xlu1 %v1344_v3, %s2859_s27  ;;  %v1188_v3 = vmul.f32 %v2697_v27, %v3180_v44 }
 0x496   : > { %1362 = vrot.lane.b32.xlu0 %v1345_v5, %s2859_s27  ;;  %v2731_v5 = vpop.permute.xlu1 %2730 }
 0x497   : > { %v2732_v23 = vunpack.i.l.bf16 %v2731_v5 }
 0x498   : > { %1440 = vrot.lane.b32.xlu1 %v1424_v10, %s2860_s16  ;;  %v1268_v10 = vmul.f32 %v2709_v4, %v3180_v44 }
 0x499   : > { %v1428_v63 = vmul.f32 %v2732_v23, %v3180_v44 }
 0x49a   : > { %1442 = vrot.lane.b32.xlu0 %v1425_v12, %s2860_s16  ;;  %v3321_v12 = vpop.permute.xlu1 %2742 }
 0x49c   : > { %972 = vrot.lane.b32.xlu1 %v950_v24, %s2854_s0  ;;  %v2733_v24 = vunpack.i.h.bf16 %v2731_v5 }
 0x49e   : > { %974 = vrot.lane.b32.xlu0 %v951_v29, %s2854_s0  ;;  %v1429_v32 = vmul.f32 %v2733_v24, %v3186_v54 }
 0x4a0   : > { %1052 = vrot.lane.b32.xlu1 %v1030_v34, %s2855_s30  ;;  %v2748_v34 = vpop.permute.xlu1 %2747 }
 0x4a1   : > { %v2750_v45 = vunpack.i.h.bf16 %v2748_v34  ;;  %v2749_v46 = vunpack.i.l.bf16 %v2748_v34 }
 0x4a2   : > { %1054 = vrot.lane.b32.xlu0 %v1031_v20, %s2855_s30 }
 0x4a3   : > { %v898_v15 = vmul.f32 %v2749_v46, %v3159_v25 }
 0x4a4   : > { %1132 = vrot.lane.b32.xlu1 %v1110_v40, %s2856_s7  ;;  %v3335_v38 = vpop.permute.xlu1 %2758 }
 0x4a6   : > { %1134 = vrot.lane.b32.xlu0 %v1111_v30, %s2856_s7 }
 0x4a8   : > { %1212 = vrot.lane.b32.xlu1 %v1190_v22, %s2857_s20 }
 0x4aa   : > { %1214 = vrot.lane.b32.xlu0 %v1191_v47, %s2857_s20 }
 0x4ac   : > { %1292 = vrot.lane.b32.xlu1 %v1270_v51, %s2858_s24  ;;  %v899_v51 = vmul.f32 %v2750_v45, %v3168_v31 }
 0x4ae   : > { %1294 = vrot.lane.b32.xlu0 %v1271_v11, %s2858_s24 }
 0x4b0   : > { %1372 = vrot.lane.b32.xlu1 %v1350_v55, %s2859_s27 }
 0x4b2   : > { %1374 = vrot.lane.b32.xlu0 %v1351_v17, %s2859_s27 }
 0x4b4   : > { %968 = vrot.lane.b32.xlu1 %v948_v0, %s2854_s0 }
 0x4b6   : > { %970 = vrot.lane.b32.xlu0 %v949_v2, %s2854_s0  ;;  %s2282_s0 = sshll.u32 %s2964_s22, 7  ;;  %s2862_s22 = smov [#allocation2]  }
 0x4b7   : > { %s2784_s23 = sshll.u32 %s2862_s22, 4  ;;  %s2785_s23 = int_to_ptr.vmem [resolvable:$false] %s2784_s23 }
 0x4b8   : > { %1048 = vrot.lane.b32.xlu1 %v3193_v59, %s2855_s30  ;;  %v1189_v59 = vmul.f32 %v2698_v19, %v3186_v54 }
 0x4ba   : > { %1050 = vrot.lane.b32.xlu0 %v3196_v60, %s2855_s30  ;;  %v2710_v60 = vunpack.i.h.bf16 %v2708_v26  ;;  %v2737_v26 = vpop.permute.xlu0 %2736 }
 0x4bb   : > { %v2738_v29 = vunpack.i.l.bf16 %v2737_v26  ;;  %v2739_v36 = vunpack.i.h.bf16 %v2737_v26 }
 0x4bc   : > { %1128 = vrot.lane.b32.xlu1 %v3199_v61, %s2856_s7  ;;  %v2720_v61 = vunpack.i.l.bf16 %v2719_v8  ;;  %v1269_v6 = vmul.f32 %v2710_v60, %v3186_v54 }
 0x4bd   : > { %v1430_v20 = vmul.f32 %v2738_v29, %v3178_v42  ;;  %v1431_v37 = vmul.f32 %v2739_v36, %v3184_v50  ;;  %v2744_v29 = vunpack.i.l.bf16 %v3321_v12 }
 0x4be   : > { %1130 = vrot.lane.b32.xlu0 %v3202_v62, %s2856_s7  ;;  %v2721_v62 = vunpack.i.h.bf16 %v2719_v8  ;;  %v1348_v18 = vmul.f32 %v2720_v61, %v3180_v44  ;;  %v3338_v39 = vpop.permute.xlu0 %2753 }
 0x4bf   : > { %v896_v36 = vmul.f32 %v2744_v29, %v3163_v28  ;;  %v2761_v29 = vunpack.i.h.bf16 %v3335_v38 }
 0x4c0   : > { %1208 = vrot.lane.b32.xlu1 %v1188_v3, %s2857_s20  ;;  %v1349_v21 = vmul.f32 %v2721_v62, %v3186_v54 }
 0x4c2   : > { %1210 = vrot.lane.b32.xlu0 %v1189_v59, %s2857_s20 }
 0x4c4   : > { %1288 = vrot.lane.b32.xlu1 %v1268_v10, %s2858_s24 }
 0x4c6   : > { %1290 = vrot.lane.b32.xlu0 %v1269_v6, %s2858_s24 }
 0x4c8   : > { %1368 = vrot.lane.b32.xlu1 %v1348_v18, %s2859_s27 }
 0x4ca   : > { %1370 = vrot.lane.b32.xlu0 %v1349_v21, %s2859_s27  ;;  %s3478_s27 = scalar_lea.hbm %s3536_s15, %s2282_s0 }
 0x4cc   : > { %1448 = vrot.lane.b32.xlu1 %v1428_v63, %s2860_s16  ;;  %v2745_v63 = vunpack.i.h.bf16 %v3321_v12 }
 0x4ce   : > { %1450 = vrot.lane.b32.xlu0 %v1429_v32, %s2860_s16 }
 0x4d0   : > { %1452 = vrot.lane.b32.xlu1 %v1430_v20, %s2860_s16  ;;  %v897_v20 = vmul.f32 %v2745_v63, %v3170_v33 }
 0x4d2   : > { %1454 = vrot.lane.b32.xlu0 %v1431_v37, %s2860_s16 }
 0x4d6   : > { %v965_v40 = vpop.permute.xlu1 %964 }
 0x4d7   : > { %v986_v11 = vadd.f32 %v965_v40, %v898_v15 }
 0x4d8   : > { %v967_v41 = vpop.permute.xlu0 %966 }
 0x4d9   : > { %v987_v55 = vadd.f32 %v967_v41, %v899_v51 }
 0x4da   : > { %v1045_v30 = vpop.permute.xlu1 %1044 }
 0x4db   : > { %v1066_v17 = vadd.f32 %v1045_v30, %v986_v11 }
 0x4dc   : > { %v1047_v43 = vpop.permute.xlu0 %1046 }
 0x4dd   : > { %v1067_v58 = vadd.f32 %v1047_v43, %v987_v55 }
 0x4de   : > { %v1125_v22 = vpop.permute.xlu1 %1124 }
 0x4df   : > { %v1146_v2 = vadd.f32 %v1125_v22, %v1066_v17 }
 0x4e0   : > { %v1127_v47 = vpop.permute.xlu0 %1126 }
 0x4e1   : > { %v1147_v27 = vadd.f32 %v1127_v47, %v1067_v58 }
 0x4e2   : > { %v1205_v9 = vpop.permute.xlu1 %1204 }
 0x4e3   : > { %v1226_v3 = vadd.f32 %v1205_v9, %v1146_v2 }
 0x4e4   : > { %v1207_v52 = vpop.permute.xlu0 %1206 }
 0x4e5   : > { %v1227_v4 = vadd.f32 %v1207_v52, %v1147_v27 }
 0x4e6   : > { %v1285_v57 = vpop.permute.xlu1 %1284 }
 0x4e7   : > { %v1306_v59 = vadd.f32 %v1285_v57, %v1226_v3 }
 0x4e8   : > { %v1287_v0 = vpop.permute.xlu0 %1286 }
 0x4e9   : > { %v1307_v8 = vadd.f32 %v1287_v0, %v1227_v4 }
 0x4ea   : > { %v1365_v19 = vpop.permute.xlu1 %1364 }
 0x4eb   : > { %v1386_v10 = vadd.f32 %v1365_v19, %v1306_v59 }
 0x4ec   : > { %v1367_v5 = vpop.permute.xlu0 %1366 }
 0x4ed   : > { %v1387_v25 = vadd.f32 %v1367_v5, %v1307_v8 }
 0x4ee   : > { %v1445_v60 = vpop.permute.xlu1 %1444 }
 0x4ef   : > { %v1466_v31 = vadd.f32 %v1445_v60, %v1386_v10 }
 0x4f0   : > { %v1447_v61 = vpop.permute.xlu0 %1446 }
 0x4f1   : > { %v1467_v6 = vadd.f32 %v1447_v61, %v1387_v25 }
 0x4f2   : > { %v961_v62 = vpop.permute.xlu1 %960 }
 0x4f3   : > { %v1473_v23 = vpack.c.bf16 %v1467_v6, %v1466_v31  ;;  %v984_v40 = vadd.f32 %v961_v62, %v896_v36 }
 0x4f4   : > { %v963_v18 = vpop.permute.xlu0 %962 }
 0x4f5   : > { %v985_v41 = vadd.f32 %v963_v18, %v897_v20 }
 0x4f6   : > { %v1041_v24 = vpop.permute.xlu1 %1040 }
 0x4f7   : > { %v1064_v43 = vadd.f32 %v1041_v24, %v984_v40 }
 0x4f8   : > { %v1043_v21 = vpop.permute.xlu0 %1042 }
 0x4f9   : > { %v1065_v22 = vadd.f32 %v1043_v21, %v985_v41 }
 0x4fa   : > { %v1121_v26 = vpop.permute.xlu1 %1120 }
 0x4fb   : > { %v1144_v46 = vadd.f32 %v1121_v26, %v1064_v43  ;;  %v2756_v26 = vunpack.i.h.bf16 %v3338_v39  ;;  %v903_v43 = vmul.f32 %v2761_v29, %v3184_v50 }
 0x4fc   : > { %v1123_v32 = vpop.permute.xlu0 %1122 }
 0x4fd   : > { %v1145_v47 = vadd.f32 %v1123_v32, %v1065_v22  ;;  %v2760_v32 = vunpack.i.l.bf16 %v3335_v38  ;;  %v901_v36 = vmul.f32 %v2756_v26, %v3186_v54 }
 0x4fe   : > { %v1201_v34 = vpop.permute.xlu1 %1200 }
 0x4ff   : > { %v1224_v15 = vadd.f32 %v1201_v34, %v1144_v46 }
 0x500   : > { %v1203_v37 = vpop.permute.xlu0 %1202 }
 0x501   : > { %v1225_v51 = vadd.f32 %v1203_v37, %v1145_v47 }
 0x502   : > { %v1281_v30 = vpop.permute.xlu1 %1280 }
 0x503   : > { %v1304_v12 = vadd.f32 %v1281_v30, %v1224_v15  ;;  %v902_v30 = vmul.f32 %v2760_v32, %v3178_v42 }
 0x504   : > { %v1283_v45 = vpop.permute.xlu0 %1282 }
 0x505   : > { %v1305_v11 = vadd.f32 %v1283_v45, %v1225_v51 }
 0x506   : > { %v1361_v9 = vpop.permute.xlu1 %1360 }
 0x507   : > { %v1384_v57 = vadd.f32 %v1361_v9, %v1304_v12 }
 0x508   : > { %v1363_v52 = vpop.permute.xlu0 %1362 }
 0x509   : > { %v1385_v28 = vadd.f32 %v1363_v52, %v1305_v11 }
 0x50a   : > { %v1441_v55 = vpop.permute.xlu1 %1440 }
 0x50b   : > { %v1464_v33 = vadd.f32 %v1441_v55, %v1384_v57 }
 0x50c   : > { %v1443_v17 = vpop.permute.xlu0 %1442 }
 0x50d   : > { %v1465_v58 = vadd.f32 %v1443_v17, %v1385_v28 }
 0x50e   : > { %v973_v0 = vpop.permute.xlu1 %972 }
 0x50f   : > { %v1472_v2 = vpack.c.bf16 %v1465_v58, %v1464_v33  ;;  %v990_v46 = vadd.f32 %v973_v0, %v902_v30 }
 0x510   : > { %v975_v27 = vpop.permute.xlu0 %974 }
 0x511   : > { %2397 = vmatprep.mubr.msk.bf16.mxu0 %vm494_vm0, %v1472_v2  ;;  %v991_v47 = vadd.f32 %v975_v27, %v903_v43 }
 0x512   : > { %2398 = vmatmul.mubr.msk.bf16.vlgmr.msra.gmra.mrb[8].mxu0 %vm494_vm0, %v1473_v23  ;;  %v1053_v19 = vpop.permute.xlu1 %1052  ;;  %v2755_v23 = vunpack.i.l.bf16 %v3338_v39 }
 0x513   : > { %v1070_v51 = vadd.f32 %v1053_v19, %v990_v46 }
 0x514   : > { %v1055_v3 = vpop.permute.xlu0 %1054  ;;  %v900_v34 = vmul.f32 %v2755_v23, %v3180_v44 }
 0x515   : > { %v1071_v44 = vadd.f32 %v1055_v3, %v991_v47 }
 0x516   : > { %v1133_v4 = vpop.permute.xlu1 %1132 }
 0x517   : > { %v1150_v11 = vadd.f32 %v1133_v4, %v1070_v51 }
 0x518   : > { %v1135_v5 = vpop.permute.xlu0 %1134 }
 0x519   : > { %v1151_v55 = vadd.f32 %v1135_v5, %v1071_v44 }
 0x51a   : > { %v1213_v59 = vpop.permute.xlu1 %1212 }
 0x51b   : > { %v1230_v17 = vadd.f32 %v1213_v59, %v1150_v11  ;;  %v2762_v59 = vld [vmem:[%s3530_s9] sm:$0xff]   ;;  %v2765_v11 = vld [vmem:[%s3531_s10 + $0x8] sm:$0xff]  }
 0x51c   : > { %v1215_v8 = vpop.permute.xlu0 %1214  ;;  %2405 = vmatprep.subr.bf16.mxu0 %v2762_v59 }
 0x51d   : > { %v1231_v50 = vadd.f32 %v1215_v8, %v1151_v55  ;;  %v2763_v8 = vld [vmem:[%s3530_s9 + $0x8] sm:$0xff]   ;;  %2406 = vmatpush3.bf16.msra.mxu0 %v2762_v59 }
 0x51e   : > { %v1293_v60 = vpop.permute.xlu1 %1292  ;;  %2407 = vmatprep.subr.bf16.mxu0 %v2763_v8 }
 0x51f   : > { %v1310_v0 = vadd.f32 %v1293_v60, %v1230_v17  ;;  %v3367_v60 = vld [vmem:[%s3535_s14] sm:$0x7] }
 0x520   : > { %v1295_v10 = vpop.permute.xlu0 %1294  ;;  %v1580_v55 = vrot.slane %v3367_v60, %v3018_v16 }
 0x521   : > { %v1311_v27 = vadd.f32 %v1295_v10, %v1231_v50  ;;  %2408 = vmatpush3.bf16.msra.mxu0 %v2763_v8  ;;  %v1480_v10 = vrot.slane %v3367_v60, %v3010_v14 }
 0x522   : > { %v1373_v25 = vpop.permute.xlu1 %1372 }
 0x523   : > { %v1390_v19 = vadd.f32 %v1373_v25, %v1310_v0 }
 0x524   : > { %v1375_v61 = vpop.permute.xlu0 %1374 }
 0x525   : > { %v1391_v3 = vadd.f32 %v1375_v61, %v1311_v27 }
 0x526   : > { %v969_v31 = vpop.permute.xlu1 %968 }
 0x527   : > { %v988_v37 = vadd.f32 %v969_v31, %v900_v34 }
 0x528   : > { %v971_v6 = vpop.permute.xlu0 %970 }
 0x529   : > { %v989_v40 = vadd.f32 %v971_v6, %v901_v36 }
 0x52a   : > { %v1049_v62 = vpop.permute.xlu1 %1048 }
 0x52b   : > { %v1068_v22 = vadd.f32 %v1049_v62, %v988_v37 }
 0x52c   : > { %v1051_v18 = vpop.permute.xlu0 %1050 }
 0x52d   : > { %v1069_v45 = vadd.f32 %v1051_v18, %v989_v40 }
 0x52e   : > { %v1129_v24 = vpop.permute.xlu1 %1128 }
 0x52f   : > { %v1148_v9 = vadd.f32 %v1129_v24, %v1068_v22 }
 0x530   : > { %v1131_v21 = vpop.permute.xlu0 %1130 }
 0x531   : > { %v1149_v15 = vadd.f32 %v1131_v21, %v1069_v45 }
 0x532   : > { %v1209_v63 = vpop.permute.xlu1 %1208 }
 0x533   : > { %v1228_v52 = vadd.f32 %v1209_v63, %v1148_v9 }
 0x534   : > { %v1211_v20 = vpop.permute.xlu0 %1210 }
 0x535   : > { %v1229_v54 = vadd.f32 %v1211_v20, %v1149_v15 }
 0x536   : > { %v1289_v41 = vpop.permute.xlu1 %1288 }
 0x537   : > { %v1308_v57 = vadd.f32 %v1289_v41, %v1228_v52 }
 0x538   : > { %v1291_v39 = vpop.permute.xlu0 %1290 }
 0x539   : > { %v1309_v28 = vadd.f32 %v1291_v39, %v1229_v54 }
 0x53a   : > { %v1369_v38 = vpop.permute.xlu1 %1368 }
 0x53b   : > { %v1388_v33 = vadd.f32 %v1369_v38, %v1308_v57 }
 0x53c   : > { %v1371_v12 = vpop.permute.xlu0 %1370 }
 0x53d   : > { %v1389_v58 = vadd.f32 %v1371_v12, %v1309_v28  ;;  %v2764_v12 = vld [vmem:[%s3531_s10] sm:$0xff]  }
 0x53e   : > { %v1449_v42 = vpop.permute.xlu1 %1448  ;;  %2417 = vmatprep.subr.bf16.mxu1 %v2764_v12 }
 0x53f   : > { %v1468_v31 = vadd.f32 %v1449_v42, %v1388_v33  ;;  %2418 = vmatpush3.bf16.msra.mxu1 %v2764_v12 }
 0x540   : > { %v1451_v2 = vpop.permute.xlu0 %1450  ;;  %2419 = vmatprep.subr.bf16.mxu1 %v2765_v11 }
 0x541   : > { %v1469_v6 = vadd.f32 %v1451_v2, %v1389_v58 }
 0x542   : > { %v1453_v62 = vpop.permute.xlu1 %1452 }
 0x543   : > { %v1474_v18 = vpack.c.bf16 %v1469_v6, %v1468_v31  ;;  %v1470_v21 = vadd.f32 %v1453_v62, %v1390_v19  ;;  %2420 = vmatpush3.bf16.msra.mxu1 %v2765_v11  ;;  %v1782_v11 = vld [vmem:[%s3526_s5 + $0x28] sm:$0xff] }
 0x544   : > { %v1455_v24 = vpop.permute.xlu0 %1454 }
 0x545   : > { %v1471_v4 = vadd.f32 %v1455_v24, %v1391_v3  ;;  %2401 = vmatprep.mubr.msk.bf16.mxu0 %vm494_vm0, %v1474_v18 }
 0x547   : > { %v1475_v5 = vpack.c.bf16 %v1471_v4, %v1470_v21 }
 0x549   : > { %2402 = vmatmul.mubr.msk.bf16.gmra.mrb[12].mxu0 %vm494_vm0, %v1475_v5 }
 0x5e5   : > { %v2399_v25 = vpop.f32.mrb[8].mxu0 }
 0x5e6   : > { %v1539_v61 = vadd.f32 %v2399_v25, %v1480_v10  ;;  %v1530_v26 = vpop.f32.mrb[9].mxu0 }
 0x5e7   : > { %v1531_v23 = vadd.f32 %v1530_v26, %v1480_v10  ;;  %v2400_v63 = vpop.f32.mrb[10].mxu0 }
 0x5e8   : > { %v1542_v29 = vadd.f32 %v2400_v63, %v1480_v10  ;;  %v1533_v32 = vpop.f32.mrb[11].mxu0  ;;  %v1563_v36 = vmax.f32 %v1539_v61, 0.0 }
 0x5e9   : > { %v1534_v34 = vadd.f32 %v1533_v32, %v1480_v10  ;;  %v1561_v37 = vmax.f32 %v1531_v23, 0.0 }
 0x5ea   : > { %v1564_v20 = vmax.f32 %v1542_v29, 0.0 }
 0x5eb   : > { %v1562_v40 = vmax.f32 %v1534_v34, 0.0 }
 0x5ec   : > { %v1570_v41 = vpack.c.bf16 %v1564_v20, %v1563_v36  ;;  %v2861_v36 = vmov 0.0|0.0  }
 0x5ed   : > { %v1569_v30 = vpack.c.bf16 %v1562_v40, %v1561_v37  ;;  %2501 = vmatprep.subr.bf16.mxu0 %v2861_v36  ;;  %2513 = vmatprep.subr.bf16.mxu1 %v2861_v36 }
 0x5ef   : > { %2409 = vmatprep.mubr.msk.bf16.mxu0 %vm1593_vm3, %v1569_v30  ;;  %v1777_v30 = vld [vmem:[%s3526_s5] sm:$0xff] }
 0x5f0   : > { %2410 = vmatmul.mubr.msk.bf16.vlgmr.msra.gmra.mrb[16].mxu0 %vm1593_vm3, %v1570_v41 }
 0x61c   : > { %v2403_v14 = vpop.f32.mrb[12].mxu0 }
 0x61d   : > { %v1555_v43 = vadd.f32 %v2403_v14, %v1480_v10  ;;  %v1546_v22 = vpop.f32.mrb[13].mxu0 }
 0x61e   : > { %v1547_v45 = vadd.f32 %v1546_v22, %v1480_v10  ;;  %v2404_v39 = vpop.f32.mrb[14].mxu0 }
 0x61f   : > { %v1558_v46 = vadd.f32 %v2404_v39, %v1480_v10  ;;  %v1549_v47 = vpop.f32.mrb[15].mxu0  ;;  %v1567_v15 = vmax.f32 %v1555_v43, 0.0  ;;  %v1778_v43 = vld [vmem:[%s3526_s5 + $0x8] sm:$0xff] }
 0x620   : > { %v1550_v9 = vadd.f32 %v1549_v47, %v1480_v10  ;;  %v1565_v51 = vmax.f32 %v1547_v45, 0.0 }
 0x621   : > { %v1568_v38 = vmax.f32 %v1558_v46, 0.0  ;;  %v1779_v46 = vld [vmem:[%s3526_s5 + $0x10] sm:$0xff] }
 0x622   : > { %v1566_v44 = vmax.f32 %v1550_v9, 0.0  ;;  %v1780_v9 = vld [vmem:[%s3526_s5 + $0x18] sm:$0xff] }
 0x623   : > { %v1572_v52 = vpack.c.bf16 %v1568_v38, %v1567_v15 }
 0x624   : > { %v1571_v54 = vpack.c.bf16 %v1566_v44, %v1565_v51 }
 0x626   : > { %2413 = vmatprep.mubr.msk.bf16.mxu0 %vm1593_vm3, %v1571_v54  ;;  %v1781_v54 = vld [vmem:[%s3526_s5 + $0x20] sm:$0xff] }
 0x627   : > { %2414 = vmatmul.mubr.msk.bf16.gmra.mrb[20].mxu0 %vm1593_vm3, %v1572_v52 }
 0x628   : > { %2445 = vmatprep.mubr.msk.f32.mxu0 %vm2845_vm1, %v2844_v7 }
 0x6c3   : > { %v2411_v57 = vpop.f32.mrb[16].mxu0 }
 0x6c4   : > { %v1649_v28 = vadd.f32 %v2411_v57, %v1580_v55  ;;  %v1640_v42 = vpop.f32.mrb[17].mxu0 }
 0x6c5   : > { %v1641_v17 = vadd.f32 %v1640_v42, %v1580_v55  ;;  %v2412_v50 = vpop.f32.mrb[18].mxu0  ;;  %v1783_v42 = vld [vmem:[%s3526_s5 + $0x30] sm:$0xff] }
 0x6c6   : > { %v1652_v33 = vadd.f32 %v2412_v50, %v1580_v55  ;;  %v1643_v58 = vpop.f32.mrb[19].mxu0  ;;  %v1673_v0 = vmax.f32 %v1649_v28, 0.0  ;;  %v1784_v50 = vld [vmem:[%s3526_s5 + $0x38] sm:$0xff] }
 0x6c7   : > { %v1644_v2 = vadd.f32 %v1643_v58, %v1580_v55  ;;  %v1671_v31 = vmax.f32 %v1641_v17, 0.0 }
 0x6c8   : > { %v1674_v27 = vmax.f32 %v1652_v33, 0.0 }
 0x6c9   : > { %v1672_v6 = vmax.f32 %v1644_v2, 0.0 }
 0x6ca   : > { %v1680_v62 = vpack.c.bf16 %v1674_v27, %v1673_v0  ;;  %v3423_v27 = vld [vmem:[%s3534_s13] sm:$0xff] }
 0x6cb   : > { %v1679_v19 = vpack.c.bf16 %v1672_v6, %v1671_v31  ;;  %v523_v31 = vrot.slane %v3423_v27, %v522_v56 }
 0x6cd   : > { %2421 = vmatprep.mubr.msk.bf16.mxu1 %vm1593_vm3, %v1679_v19  ;;  %v594_v19 = vadd.f32 %v3079_v1, %v523_v31 }
 0x6ce   : > { %2422 = vmatmul.mubr.msk.bf16.vlgmr.msra.gmra.mrb[4].mxu1 %vm1593_vm3, %v1680_v62  ;;  %v1776_v62 = vld [vmem:[%s3527_s6] sm:$0xff] }
 0x6fa   : > { %v2415_v3 = vpop.f32.mrb[20].mxu0 }
 0x6fb   : > { %v1665_v16 = vadd.f32 %v2415_v3, %v1580_v55  ;;  %v1656_v18 = vpop.f32.mrb[21].mxu0 }
 0x6fc   : > { %v1657_v24 = vadd.f32 %v1656_v18, %v1580_v55  ;;  %v2416_v21 = vpop.f32.mrb[22].mxu0 }
 0x6fd   : > { %v1668_v4 = vadd.f32 %v2416_v21, %v1580_v55  ;;  %v1659_v5 = vpop.f32.mrb[23].mxu0  ;;  %v1677_v8 = vmax.f32 %v1665_v16, 0.0 }
 0x6fe   : > { %v1660_v59 = vadd.f32 %v1659_v5, %v1580_v55  ;;  %v1675_v25 = vmax.f32 %v1657_v24, 0.0 }
 0x6ff   : > { %v1678_v10 = vmax.f32 %v1668_v4, 0.0 }
 0x700   : > { %v1676_v61 = vmax.f32 %v1660_v59, 0.0 }
 0x701   : > { %v1682_v26 = vpack.c.bf16 %v1678_v10, %v1677_v8  ;;  %v1992_v10 = vld [vmem:[%s3532_s11] sm:$0xff] }
 0x702   : > { %v1681_v23 = vpack.c.bf16 %v1676_v61, %v1675_v25  ;;  %v2071_v25 = vld [vmem:[%s3533_s12] sm:$0xff]  ;;  %v2072_v61 = vld [vmem:[%s3533_s12 + $0x8] sm:$0xff] }
 0x704   : > { %2425 = vmatprep.mubr.msk.bf16.mxu1 %vm1593_vm3, %v1681_v23  ;;  %v2514_v23 = vpack.c.bf16 %v2072_v61, %v2071_v25 }
 0x705   : > { %2426 = vmatmul.mubr.msk.bf16.gmra.mrb[8].mxu1 %vm1593_vm3, %v1682_v26  ;;  %v2073_v26 = vld [vmem:[%s3533_s12 + $0x10] sm:$0xff] }
 0x706   : > { %2466 = vmatprep.mubr.msk.f32.mxu1 %vm2845_vm1, %v2844_v7  ;;  %2515 = vmatpush3.bf16.msra.mxu1 %v2514_v23 }
 0x707   : > { %2516 = vmatprep.subr.bf16.mxu1 %v2861_v36 }
 0x7a1   : > { %v2423_v63 = vpop.f32.mrb[4].mxu1 }
 0x7a2   : > { %v1745_v29 = vpop.f32.mrb[5].mxu1 }
 0x7a3   : > { %1787 = vperm.xlu1 %2740, %v1745_v29   ;;  %v2424_v32 = vpop.f32.mrb[6].mxu1 }
 0x7a4   : > { %v1748_v34 = vpop.f32.mrb[7].mxu1 }
 0x7a5   : > { %1792 = vperm.xlu0 %2751, %v1748_v34  }
 0x7a7   : > { %1797 = vperm.xlu1 %2740, %v2423_v63  }
 0x7a9   : > { %1802 = vperm.xlu0 %2751, %v2424_v32   ;;  %v2779_v32 = vld [vmem:[%s2996_s25] sm:$0xff]  ;;  %s483_s25 = sand.u32 1, %s2834_s19  }
 0x7aa   : > { %s2254_s26 = sshll.u32 %s483_s25, 3  ;;  %s2178_s16 = scalar_lea.sflag [#allocation3], %s483_s25 }
 0x7ab   : > { %s485_s30 = scalar_lea.vmem [#allocation2], %s2254_s26  ;;  %s2786_s26 = scalar_lea.vmem %s2785_s23, 256 }
 0x7ac   : > { %s2191_s7 = sshll.u32 %s485_s30, 4  ;;  %s3480_s7 = int_to_ptr.vmem [resolvable:$true] %s2191_s7 }
 0x7ad   : > { %s2780_s17 = scalar_lea.vmem %s3480_s7, 128  ;;  %p2787_p0 = scmp.lt.s32.totalorder %s3480_s7, %s2785_s23 }
 0x7ae   : > { %p2781_p11 = scmp.ne.s32.totalorder %s3480_s7, %s2780_s17  ;;  %p2788_p1 = scmp.lt.s32.totalorder %s2786_s26, %s2780_s17 }
 0x7b0   : > { %p2782_p12 = pnand %p2781_p11, %p2981_p5  ;;  %p2789_p2 = por %p2788_p1, %p2787_p0 }
 0x7b2   : > { %p2783_p13 = pneg %p2782_p12 }
 0x7b4   : > { %p2790_p3 = pnand %p2789_p2, %p2783_p13 }
 0x7d8   : > { %v2427_v20 = vpop.f32.mrb[8].mxu1 }
 0x7d9   : > { %v1761_v37 = vpop.f32.mrb[9].mxu1 }
 0x7da   : > { %1807 = vperm.xlu1 %2740, %v1761_v37   ;;  %v2428_v40 = vpop.f32.mrb[10].mxu1  ;;  %v1996_v37 = vrot.slane %v3367_v60, %v3099_v35 }
 0x7db   : > { %v1764_v41 = vpop.f32.mrb[11].mxu1 }
 0x7dc   : > { %1812 = vperm.xlu0 %2751, %v1764_v41  }
 0x7de   : > { %1817 = vperm.xlu1 %2740, %v2427_v20  }
 0x7e0   : > { %1822 = vperm.xlu0 %2751, %v2428_v40  }
 0x822   : > { %v1788_v14 = vpop.permute.xlu1 %1787 }
 0x823   : > { %v1825_v45 = vmul.f32 %v1788_v14, %v1777_v30 }
 0x824   : > { %v1793_v22 = vpop.permute.xlu0 %1792 }
 0x825   : > { %v1826_v39 = vmul.f32 %v1793_v22, %v1778_v43 }
 0x826   : > { %v1798_v47 = vpop.permute.xlu1 %1797 }
 0x827   : > { %v2502_v15 = vpack.c.bf16 %v1826_v39, %v1825_v45  ;;  %v1827_v51 = vmul.f32 %v1798_v47, %v1779_v46 }
 0x828   : > { %v1803_v38 = vpop.permute.xlu0 %1802 }
 0x829   : > { %v1828_v44 = vmul.f32 %v1803_v38, %v1780_v9  ;;  %2503 = vmatpush3.bf16.msra.mxu0 %v2502_v15 }
 0x82a   : > { %2504 = vmatprep.subr.bf16.mxu0 %v2861_v36 }
 0x82b   : > { %v2505_v52 = vpack.c.bf16 %v1828_v44, %v1827_v51 }
 0x82d   : > { %2506 = vmatpush3.bf16.msra.mxu0 %v2505_v52 }
 0x82e   : > { %2507 = vmatprep.subr.bf16.mxu0 %v2861_v36 }
 0x859   : > { %v1808_v12 = vpop.permute.xlu1 %1807 }
 0x85a   : > { %v1829_v57 = vmul.f32 %v1808_v12, %v1781_v54  ;;  %v2174_v12 = vrot.slane %v3423_v27, %v772_v49 }
 0x85b   : > { %v1813_v55 = vpop.permute.xlu0 %1812 }
 0x85c   : > { %v1830_v28 = vmul.f32 %v1813_v55, %v1782_v11 }
 0x85d   : > { %v1818_v17 = vpop.permute.xlu1 %1817 }
 0x85e   : > { %v2508_v33 = vpack.c.bf16 %v1830_v28, %v1829_v57  ;;  %v1831_v2 = vmul.f32 %v1818_v17, %v1783_v42 }
 0x85f   : > { %v1823_v58 = vpop.permute.xlu0 %1822 }
 0x860   : > { %v1832_v0 = vmul.f32 %v1823_v58, %v1784_v50  ;;  %2509 = vmatpush3.bf16.msra.mxu0 %v2508_v33 }
 0x861   : > { %2510 = vmatprep.subr.bf16.mxu0 %v2861_v36  ;;  %v2078_v36 = vrot.slane %v3423_v27, %v780_v53  ;;  %v2169_v53 = vrot.slane %v3423_v27, %v768_v48 }
 0x862   : > { %v2511_v6 = vpack.c.bf16 %v1832_v0, %v1831_v2 }
 0x864   : > { %2512 = vmatpush3.bf16.msra.mxu0 %v2511_v6 }
 0x865   : > { %2448 = vmatprep.subr.mxu0 %v2844_v7 }
 0x867   : > { %2446 = vmatmul.mubr.msk.f32.vlgmr.msra.gmra.mrb[24].mxu0 %vm1833_vm4, %v1776_v62 }
 0x868   : > { %2449 = vmatpush3.msra.mxu0 %v594_v19  ;;  %2450 = vmatprep.mubr.msk.f32.mxu0 %vm2845_vm1, %v2844_v7 }
 0x869   : > { %2453 = vmatprep.subr.mxu0 %v2844_v7 }
 0x93a   : > { %v1903_v3 = vpop.f32.mrb[24].mxu0 }
 0x93b   : > { %v2447_v56 = vpop.f32.mrb[25].mxu0  ;;  %v1907_v16 = vsel %vm494_vm0, %v1903_v3, -inf }
 0x93c   : > { %1908 = vmax.xlane.f32.xlu1 %v1907_v16 }
 0x9c9   : > { %v1909_v18 = vpop.xlane.xlu1 %1908 }
 0x9ca   : > { %v1910_v24 = vsub.f32 %v1903_v3, %v1909_v18 }
 0x9cc   : > { %v1911_v21 = vmul.f32 1.442695, %v1910_v24 }
 0x9ce   : > { %2772 = vpow2.f32 %v1911_v21 }
 0x9d8   : > { %v2773_v4 = vpop.eup %2772 }
 0x9d9   : > { %v1913_v5 = vsel %vm494_vm0, %v2773_v4, 0.0 }
 0x9da   : > { %1914 = vadd.xlane.f32.xlu0 %v1913_v5 }
 0xa67   : > { %v1915_v1 = vpop.xlane.xlu0 %1914 }
 0xa68   : > { %2774 = vrcp.f32 %v1915_v1 }
 0xa72   : > { %v2775_v59 = vpop.eup %2774 }
 0xa73   : > { %v1917_v8 = vmul.f32 %v2775_v59, %v2773_v4 }
 0xa75   : > { %2451 = vmatmul.mubr.msk.f32.vlgmr.msra.gmra.mrb[26].mxu0 %vm494_vm0, %v1917_v8 }
 0xa76   : > { %2455 = vmatprep.mubr.msk.f32.mxu0 %vm2845_vm1, %v2844_v7  ;;  %2454 = vmatpush3.msra.mxu0 %v1992_v10  ;;  %v2074_v7 = vld [vmem:[%s3533_s12 + $0x18] sm:$0xff] }
 0xa77   : > { %v2517_v63 = vpack.c.bf16 %v2074_v7, %v2073_v26 }
 0xa79   : > { %2518 = vmatpush3.bf16.msra.mxu1 %v2517_v63 }
 0xb48   : > { %v1987_v29 = vpop.f32.mrb[26].mxu0 }
 0xb49   : > { %v1991_v34 = vadd.f32 %v2779_v32, %v1987_v29  ;;  %v2452_v20 = vpop.f32.mrb[27].mxu0 }
 0xb4b   : > { %2456 = vmatmul.mubr.msk.f32.vlgmr.msra.gmra.mrb[28].mxu0 %vm494_vm0, %v1991_v34 }
 0xc1e   : > { %v2066_v40 = vpop.f32.mrb[28].mxu0 }
 0xc1f   : > { %v2067_v41 = vadd.f32 %v2066_v40, %v1996_v37  ;;  %v2457_v30 = vpop.f32.mrb[29].mxu0 }
 0xc21   : > { %v2070_v14 = vmax.f32 %v2067_v41, 0.0 }
 0xc23   : > { %2467 = vmatmul.mubr.msk.f32.vlgmr.msra.gmra.mrb[12].mxu1 %vm1593_vm3, %v2070_v14 }
 0xcf6   : > { %v2148_v43 = vpop.f32.mrb[12].mxu1 }
 0xcf7   : > { %v2149_v22 = vadd.f32 %v2148_v43, %v2078_v36  ;;  %v2468_v45 = vpop.f32.mrb[13].mxu1 }
 0xcf9   : > { %v2152_v39 = vadd.f32 %v2149_v22, %v1991_v34 }
 0xcfb   : > { %v2153_v46 = vsel %vm494_vm0, %v2152_v39, 0.0 }
 0xcfc   : > { %2154 = vadd.xlane.f32.xlu0 %v2153_v46 }
 0xd89   : > { %v2155_v47 = vpop.xlane.xlu0 %2154 }
 0xd8a   : > { %v2156_v35 = vmul.f32 0.125, %v2155_v47 }
 0xd8c   : > { %v2157_v60 = vsub.f32 %v2152_v39, %v2156_v35 }
 0xd8e   : > { %v2158_v9 = vmul.f32 %v2157_v60, %v2157_v60 }
 0xd90   : > { %v2159_v15 = vsel %vm494_vm0, %v2158_v9, 0.0 }
 0xd91   : > { %2160 = vadd.xlane.f32.xlu1 %v2159_v15 }
 0xe1e   : > { %v2161_v38 = vpop.xlane.xlu1 %2160 }
 0xe1f   : > { %v2162_v51 = vmul.f32 0.125, %v2161_v38 }
 0xe21   : > { %v2163_v44 = vadd.f32 1e-05, %v2162_v51 }
 0xe23   : > { %2776 = vrsqrt.f32 %v2163_v44 }
 0xe2d   : > { %v2777_v52 = vpop.eup %2776 }
 0xe2e   : > { %v2165_v54 = vmul.f32 %v2777_v52, %v2157_v60 }
 0xe30   : > { %v2170_v11 = vmul.f32 %v2169_v53, %v2165_v54 }
 0xe32   : > { %v2175_v55 = vadd.f32 %v2174_v12, %v2170_v11 }
 0xe34   : > { %2176 = vst.msk [vmem:[%s485_s30] sm:$0xff] %vm494_vm0, %v2175_v55 }
 0xe35   : > { %2793 = shalt.err (!%p2790_p3)
}
 0xe36   : > { %s2794_s25 = scalar_lea.hbm %s3478_s27, 128  ;;  %s2798_s20 = scalar_lea.hbm %s3536_s15, 256 }
 0xe37   : > { %p2795_p4 = scmp.ne.s32.totalorder %s3478_s27, %s2794_s25  ;;  %p2799_p9 = scmp.lt.u32.totalorder %s3478_s27, %s3536_s15 }
 0xe38   : > { %p2800_p10 = scmp.lt.u32.totalorder %s2798_s20, %s2794_s25  ;;  %p2802_p12 = scmp.lt.u32.totalorder %s2794_s25, %s3478_s27 }
 0xe39   : > { %p2796_p7 = pnand %p2795_p4, %p2981_p5 }
 0xe3a   : > { %p2801_p11 = por %p2800_p10, %p2799_p9 }
 0xe3b   : > { %p2797_p8 = pneg %p2796_p7 }
 0xe3c   : > { %p2803_p13 = por %p2802_p12, %p2801_p11 }
 0xe3e   : > { %p2804_p0 = pnand %p2803_p13, %p2797_p8 }
 0xe40   : > { %2807 = shalt.err (!%p2804_p0)
}
 0xe41   : > { %2521 = dma.vmem_to_hbm [thread:$0]  (%p2981_p5), %s3480_s7, 128, %s3478_s27, %s2178_s16  }
 0xe42 PF: > { %p2527_p1 = scmp.ge.s32.totalorder %s2842_s21, 2  ;;  %s2203_s17 = sand.u32 1, %s2830_s18  }
 0xe43   : > { %s2204_s23 = scalar_lea.sflag [#allocation3], %s2203_s17 }
 0xe44   : > { %p2524_p2 = pnand %p2527_p1, %p2985_p6 }
 0xe46   : > { %2825 = dma.done.wait (!%p2524_p2), %s2204_s23, 128  }
 0xe47   : > { %2827 = vsyncadd (!%p2524_p2), %s2204_s23, 4294967168  ;;  %s3549_s21 = sld [smem:[#allocation6_spill]]  ;;  %s3550_s26 = sld [smem:[#allocation5_spill]] }
 0xe48   : > { %s3551_s20 = sld [smem:[#allocation7_spill]]  ;;  %s3552_s18 = smov %s2834_s19 }
 0xe4d   : > { %p25_p3 = scmp.ge.s32.totalorder %s3549_s21, 4   ;;  %s3553_s19 = smov %s3550_s26 }
 0xe4f   :  { %27 = sbr.rel (!%p25_p3) target bundleno = 6 (0x6), region = 115 }
 0xe56   :  { %2209 = vsyncpa [#allocation3], 1 }
 0xe57   :  { %2211 = vsyncpa [#allocation3 + $0x1], 1 }

</bundles_post_ra>
